<compile_context>
chip_gen: v5e
topology: v5e:2x2
jax: 0.10.0
libtpu: 0.0.40
codegen_flags: <defaults>
</compile_context>

<pallas_src>
import functools

import jax
import jax.numpy as jnp
from jax import lax
from jax.experimental import pallas as pl
from jax.experimental.pallas import tpu as pltpu


# ---------------------------- tiling helpers --------------------------------
def _pick_channel_block(c, max_cb=8):
    """Largest divisor of c that is <= max_cb (bounds kernel unrolling)."""
    best = 1
    for d in range(1, min(c, max_cb) + 1):
        if c % d == 0:
            best = d
    return best


def _pick_row_tile(n_rows, row_bytes, target_bytes=2 * 1024 * 1024):
    """Largest divisor of n_rows that keeps a block <= target and is
    (8,128)-friendly on the sublane dim (multiple of 8, or the full dim)."""
    cap = max(1, int(target_bytes) // max(1, int(row_bytes)))
    best = None
    for d in range(1, n_rows + 1):
        if n_rows % d:
            continue
        if d > cap:
            break
        if d == n_rows or d % 8 == 0:
            best = d
    return best if best is not None else n_rows


# ------------------------------ kernels --------------------------------------
def _squeeze_fwd_kernel(x_ref, o_ref, *, s, w_in, w_out):
    # x_ref: (1, CB, TH, s*W)     last-dim index = sh*W + w      (h = ho*s + sh)
    # o_ref: (1, CB, s*s, TH, Wo) dim-2 index    = sh*s + sw
    cb = x_ref.shape[1]
    for sw in range(s):
        # Exact one-hot gather matrix: sel[w, wo] = 1  iff  w == wo*s + sw.
        rows = lax.broadcasted_iota(jnp.int32, (w_in, w_out), 0)
        cols = lax.broadcasted_iota(jnp.int32, (w_in, w_out), 1)
        sel = (rows == cols * s + sw).astype(jnp.float32)
        for ci in range(cb):
            for sh in range(s):
                # Contiguous lane slice selects the height phase sh.
                vh = x_ref[0, ci, :, sh * w_in:(sh + 1) * w_in]
                out = lax.dot(vh.astype(jnp.float32), sel,
                              precision=lax.Precision.HIGHEST,
                              preferred_element_type=jnp.float32)
                o_ref[0, ci, sh * s + sw] = out.astype(o_ref.dtype)


def _squeeze_rev_kernel(x_ref, o_ref, *, s, w_in):
    # x_ref: (1, CB, s*s, TH, W)  dim-2 index    = sh*s + sw
    # o_ref: (1, CB, TH, s*s*W)   last-dim index = sh*(s*W) + (j*s + sw)
    cb = x_ref.shape[1]
    w_out = s * w_in
    rows = lax.broadcasted_iota(jnp.int32, (w_in, w_out), 0)   # j
    cols = lax.broadcasted_iota(jnp.int32, (w_in, w_out), 1)   # j*s + sw target
    for ci in range(cb):
        for sh in range(s):
            acc = None
            for sw in range(s):
                # Exact one-hot scatter matrix: scat[j, wi] = 1 iff wi == j*s+sw.
                scat = (cols == rows * s + sw).astype(jnp.float32)
                xin = x_ref[0, ci, sh * s + sw].astype(jnp.float32)   # (TH, W)
                term = lax.dot(xin, scat,
                               precision=lax.Precision.HIGHEST,
                               preferred_element_type=jnp.float32)
                acc = term if acc is None else acc + term
            # Contiguous lane-slice store (no strided / masked-scatter writes).
            o_ref[0, ci, :, sh * w_out:(sh + 1) * w_out] = acc.astype(o_ref.dtype)


# ------------------------------ wrapper ---------------------------------------
def squeeze_flow(x, log_det_jacobian, *, squeeze_factor=2, reverse=False):
    """Pallas implementation of SqueezeFlow.forward.  x is NCHW (PyTorch layout)."""
    s = int(squeeze_factor)
    b, c, h, w = x.shape
    itemsize = jnp.dtype(x.dtype).itemsize

    if not reverse:
        assert h % s == 0, f"Height {h} must be divisible by squeeze factor {s}."
        assert w % s == 0, f"Width {w} must be divisible by squeeze factor {s}."
        ho, wo = h // s, w // s
        cb = _pick_channel_block(c)
        th = _pick_row_tile(ho, row_bytes=cb * s * w * itemsize)
        xv = x.reshape(b, c, ho, s * w)                         # free reshape
        grid = (b, c // cb, ho // th)
        block_bytes = 2 * cb * th * s * w * itemsize            # in + out block
        vmem_limit = int(min(48 * 1024 * 1024,
                             max(32 * 1024 * 1024, 6 * block_bytes)))
        out = pl.pallas_call(
            functools.partial(_squeeze_fwd_kernel, s=s, w_in=w, w_out=wo),
            out_shape=jax.ShapeDtypeStruct((b, c, s * s, ho, wo), x.dtype),
            grid=grid,
            in_specs=[pl.BlockSpec((1, cb, th, s * w),
                                   lambda bi, ci, ti: (bi, ci, ti, 0))],
            out_specs=pl.BlockSpec((1, cb, s * s, th, wo),
                                   lambda bi, ci, ti: (bi, ci, 0, ti, 0)),
            compiler_params=pltpu.CompilerParams(
                dimension_semantics=("parallel", "parallel", "parallel"),
                vmem_limit_bytes=vmem_limit),
            cost_estimate=pl.CostEstimate(
                flops=2 * b * c * h * w * w,
                transcendentals=0,
                bytes_accessed=2 * b * c * h * w * itemsize),
        )(xv)
        z = out.reshape(b, s * s * c, ho, wo)                   # free reshape
    else:
        assert c % (s * s) == 0, f"Channels {c} must be divisible by {s * s}."
        co = c // (s * s)
        cb = _pick_channel_block(co)
        th = _pick_row_tile(h, row_bytes=cb * s * s * w * itemsize)
        xv = x.reshape(b, co, s * s, h, w)                      # free reshape
        grid = (b, co // cb, h // th)
        block_bytes = 2 * cb * s * s * th * w * itemsize        # in + out block
        vmem_limit = int(min(48 * 1024 * 1024,
                             max(32 * 1024 * 1024, 6 * block_bytes)))
        out = pl.pallas_call(
            functools.partial(_squeeze_rev_kernel, s=s, w_in=w),
            out_shape=jax.ShapeDtypeStruct((b, co, h, s * s * w), x.dtype),
            grid=grid,
            in_specs=[pl.BlockSpec((1, cb, s * s, th, w),
                                   lambda bi, ci, ti: (bi, ci, 0, ti, 0))],
            out_specs=pl.BlockSpec((1, cb, th, s * s * w),
                                   lambda bi, ci, ti: (bi, ci, ti, 0)),
            compiler_params=pltpu.CompilerParams(
                dimension_semantics=("parallel", "parallel", "parallel"),
                vmem_limit_bytes=vmem_limit),
            cost_estimate=pl.CostEstimate(
                flops=2 * b * c * h * w * w,
                transcendentals=0,
                bytes_accessed=2 * b * c * h * w * itemsize),
        )(xv)
        z = out.reshape(b, co, h * s, w * s)                    # free reshape

    # Volume-preserving permutation: log-det Jacobian passes through unchanged.
    return z, log_det_jacobian


# ---------------- pure-JAX references (literal PyTorch translation) ----------
def _ref_forward(x, s):
    b, c, h, w = x.shape
    z = x.reshape(b, c, h // s, s, w // s, s)
    z = jnp.transpose(z, (0, 1, 3, 5, 2, 4))
    return z.reshape(b, s * s * c, h // s, w // s)


def _ref_reverse(x, s):
    b, c, h, w = x.shape
    z = x.reshape(b, c // (s * s), s, s, h, w)
    z = jnp.transpose(z, (0, 1, 4, 2, 5, 3))
    return z.reshape(b, c // (s * s), h * s, w * s)


if __name__ == "__main__":
    key = jax.random.PRNGKey(0)
    kx, kl = jax.random.split(key)
    x = jax.random.normal(kx, (2, 4, 16, 16), dtype=jnp.float32)   # NCHW
    ldj = jax.random.normal(kl, (2,), dtype=jnp.float32)

    # forward (squeeze)
    z, ldj_out = squeeze_flow(x, ldj, squeeze_factor=2, reverse=False)
    z = jax.block_until_ready(z)
    z_ref = _ref_forward(x, 2)
    assert z.shape == (2, 16, 8, 8), z.shape
    assert jnp.array_equal(ldj_out, ldj)
    assert jnp.allclose(z, z_ref, atol=1e-6, rtol=0.0), "forward mismatch"

    # reverse (unsqueeze) — should invert forward
    xr, ldj_out2 = squeeze_flow(z, ldj, squeeze_factor=2, reverse=True)
    xr = jax.block_until_ready(xr)
    xr_ref = _ref_reverse(z, 2)
    assert xr.shape == x.shape, xr.shape
    assert jnp.array_equal(ldj_out2, ldj)
    assert jnp.allclose(xr, xr_ref, atol=1e-6, rtol=0.0), "reverse mismatch"
    assert jnp.allclose(xr, x, atol=1e-6, rtol=0.0), "round-trip mismatch"

    print("KERNEL_OK")
</pallas_src>

<mosaic_0001>
module attributes {stable_mosaic.version = 11 : i64} {
  func.func @_squeeze_fwd_kernel(%arg0: i32, %arg1: i32, %arg2: i32, %arg3: memref<1x4x8x32xf32, #tpu.memory_space<vmem>>, %arg4: memref<1x4x4x8x8xf32, #tpu.memory_space<vmem>>) attributes {dimension_semantics = [#tpu.dimension_semantics<parallel>, #tpu.dimension_semantics<parallel>, #tpu.dimension_semantics<parallel>], iteration_bounds = array<i64: 2, 1, 1>, scalar_prefetch = 0 : i64, scratch_operands = 0 : i64, tpu.core_type = #tpu.core_type<tc>, window_params = [{transform_indices = @transform_0, window_bounds = array<i64: 1, 4, 8, 32>}, {transform_indices = @transform_1, window_bounds = array<i64: 1, 4, 4, 8, 8>}]} {
    %0 = tpu.iota {dimensions = array<i32: 0>} : vector<16x8xi32>
    %1 = tpu.iota {dimensions = array<i32: 1>} : vector<16x8xi32>
    %c2_i32 = arith.constant 2 : i32
    %2 = vector.broadcast %c2_i32 : i32 to vector<16x8xi32>
    %3 = arith.muli %1, %2 : vector<16x8xi32>
    %c0_i32 = arith.constant 0 : i32
    %4 = vector.broadcast %c0_i32 : i32 to vector<16x8xi32>
    %5 = arith.addi %3, %4 : vector<16x8xi32>
    %6 = arith.cmpi eq, %0, %5 : vector<16x8xi32>
    %7 = arith.extui %6 : vector<16x8xi1> to vector<16x8xi32>
    %8 = arith.sitofp %7 : vector<16x8xi32> to vector<16x8xf32>
    %c0 = arith.constant 0 : index
    %c0_0 = arith.constant 0 : index
    %c0_1 = arith.constant 0 : index
    %c0_2 = arith.constant 0 : index
    %9 = vector.load %arg3[%c0, %c0_0, %c0_1, %c0_2] : memref<1x4x8x32xf32, #tpu.memory_space<vmem>>, vector<1x1x8x16xf32>
    %10 = vector.shape_cast %9 : vector<1x1x8x16xf32> to vector<8x16xf32>
    %cst = arith.constant dense<0.000000e+00> : vector<8x8xf32>
    %11 = tpu.matmul %10, %8, %cst {dimension_numbers = #tpu.dot_dimension_numbers<[1], [0], [0], [1], [0, 0, 1, 1], [], []>, precision = #tpu.contract_precision<fp32>} : vector<8x16xf32>, vector<16x8xf32>, vector<8x8xf32> -> vector<8x8xf32>
    %c0_3 = arith.constant 0 : index
    %c0_4 = arith.constant 0 : index
    %c0_5 = arith.constant 0 : index
    %c0_6 = arith.constant 0 : index
    %c0_7 = arith.constant 0 : index
    %12 = vector.load %arg4[%c0_3, %c0_4, %c0_5, %c0_6, %c0_7] : memref<1x4x4x8x8xf32, #tpu.memory_space<vmem>>, vector<1x1x1x8x8xf32>
    %13 = vector.shape_cast %12 : vector<1x1x1x8x8xf32> to vector<8x8xf32>
    %14 = vector.shape_cast %11 : vector<8x8xf32> to vector<1x1x1x8x8xf32>
    tpu.vector_store %arg4[%c0_3, %c0_4, %c0_5, %c0_6, %c0_7], %14 {strides = array<i32>} : memref<1x4x4x8x8xf32, #tpu.memory_space<vmem>>, vector<1x1x1x8x8xf32>,
    %c0_8 = arith.constant 0 : index
    %c0_9 = arith.constant 0 : index
    %c0_10 = arith.constant 0 : index
    %c16 = arith.constant 16 : index
    %15 = vector.load %arg3[%c0_8, %c0_9, %c0_10, %c16] : memref<1x4x8x32xf32, #tpu.memory_space<vmem>>, vector<1x1x8x16xf32>
    %16 = vector.shape_cast %15 : vector<1x1x8x16xf32> to vector<8x16xf32>
    %cst_11 = arith.constant dense<0.000000e+00> : vector<8x8xf32>
    %17 = tpu.matmul %16, %8, %cst_11 {dimension_numbers = #tpu.dot_dimension_numbers<[1], [0], [0], [1], [0, 0, 1, 1], [], []>, precision = #tpu.contract_precision<fp32>} : vector<8x16xf32>, vector<16x8xf32>, vector<8x8xf32> -> vector<8x8xf32>
    %c0_12 = arith.constant 0 : index
    %c0_13 = arith.constant 0 : index
    %c2 = arith.constant 2 : index
    %c0_14 = arith.constant 0 : index
    %c0_15 = arith.constant 0 : index
    %18 = vector.load %arg4[%c0_12, %c0_13, %c2, %c0_14, %c0_15] : memref<1x4x4x8x8xf32, #tpu.memory_space<vmem>>, vector<1x1x1x8x8xf32>
    %19 = vector.shape_cast %18 : vector<1x1x1x8x8xf32> to vector<8x8xf32>
    %20 = vector.shape_cast %17 : vector<8x8xf32> to vector<1x1x1x8x8xf32>
    tpu.vector_store %arg4[%c0_12, %c0_13, %c2, %c0_14, %c0_15], %20 {strides = array<i32>} : memref<1x4x4x8x8xf32, #tpu.memory_space<vmem>>, vector<1x1x1x8x8xf32>,
    %c0_16 = arith.constant 0 : index
    %c1 = arith.constant 1 : index
    %c0_17 = arith.constant 0 : index
    %c0_18 = arith.constant 0 : index
    %21 = vector.load %arg3[%c0_16, %c1, %c0_17, %c0_18] : memref<1x4x8x32xf32, #tpu.memory_space<vmem>>, vector<1x1x8x16xf32>
    %22 = vector.shape_cast %21 : vector<1x1x8x16xf32> to vector<8x16xf32>
    %cst_19 = arith.constant dense<0.000000e+00> : vector<8x8xf32>
    %23 = tpu.matmul %22, %8, %cst_19 {dimension_numbers = #tpu.dot_dimension_numbers<[1], [0], [0], [1], [0, 0, 1, 1], [], []>, precision = #tpu.contract_precision<fp32>} : vector<8x16xf32>, vector<16x8xf32>, vector<8x8xf32> -> vector<8x8xf32>
    %c0_20 = arith.constant 0 : index
    %c1_21 = arith.constant 1 : index
    %c0_22 = arith.constant 0 : index
    %c0_23 = arith.constant 0 : index
    %c0_24 = arith.constant 0 : index
    %24 = vector.load %arg4[%c0_20, %c1_21, %c0_22, %c0_23, %c0_24] : memref<1x4x4x8x8xf32, #tpu.memory_space<vmem>>, vector<1x1x1x8x8xf32>
    %25 = vector.shape_cast %24 : vector<1x1x1x8x8xf32> to vector<8x8xf32>
    %26 = vector.shape_cast %23 : vector<8x8xf32> to vector<1x1x1x8x8xf32>
    tpu.vector_store %arg4[%c0_20, %c1_21, %c0_22, %c0_23, %c0_24], %26 {strides = array<i32>} : memref<1x4x4x8x8xf32, #tpu.memory_space<vmem>>, vector<1x1x1x8x8xf32>,
    %c0_25 = arith.constant 0 : index
    %c1_26 = arith.constant 1 : index
    %c0_27 = arith.constant 0 : index
    %c16_28 = arith.constant 16 : index
    %27 = vector.load %arg3[%c0_25, %c1_26, %c0_27, %c16_28] : memref<1x4x8x32xf32, #tpu.memory_space<vmem>>, vector<1x1x8x16xf32>
    %28 = vector.shape_cast %27 : vector<1x1x8x16xf32> to vector<8x16xf32>
    %cst_29 = arith.constant dense<0.000000e+00> : vector<8x8xf32>
    %29 = tpu.matmul %28, %8, %cst_29 {dimension_numbers = #tpu.dot_dimension_numbers<[1], [0], [0], [1], [0, 0, 1, 1], [], []>, precision = #tpu.contract_precision<fp32>} : vector<8x16xf32>, vector<16x8xf32>, vector<8x8xf32> -> vector<8x8xf32>
    %c0_30 = arith.constant 0 : index
    %c1_31 = arith.constant 1 : index
    %c2_32 = arith.constant 2 : index
    %c0_33 = arith.constant 0 : index
    %c0_34 = arith.constant 0 : index
    %30 = vector.load %arg4[%c0_30, %c1_31, %c2_32, %c0_33, %c0_34] : memref<1x4x4x8x8xf32, #tpu.memory_space<vmem>>, vector<1x1x1x8x8xf32>
    %31 = vector.shape_cast %30 : vector<1x1x1x8x8xf32> to vector<8x8xf32>
    %32 = vector.shape_cast %29 : vector<8x8xf32> to vector<1x1x1x8x8xf32>
    tpu.vector_store %arg4[%c0_30, %c1_31, %c2_32, %c0_33, %c0_34], %32 {strides = array<i32>} : memref<1x4x4x8x8xf32, #tpu.memory_space<vmem>>, vector<1x1x1x8x8xf32>,
    %c0_35 = arith.constant 0 : index
    %c2_36 = arith.constant 2 : index
    %c0_37 = arith.constant 0 : index
    %c0_38 = arith.constant 0 : index
    %33 = vector.load %arg3[%c0_35, %c2_36, %c0_37, %c0_38] : memref<1x4x8x32xf32, #tpu.memory_space<vmem>>, vector<1x1x8x16xf32>
    %34 = vector.shape_cast %33 : vector<1x1x8x16xf32> to vector<8x16xf32>
    %cst_39 = arith.constant dense<0.000000e+00> : vector<8x8xf32>
    %35 = tpu.matmul %34, %8, %cst_39 {dimension_numbers = #tpu.dot_dimension_numbers<[1], [0], [0], [1], [0, 0, 1, 1], [], []>, precision = #tpu.contract_precision<fp32>} : vector<8x16xf32>, vector<16x8xf32>, vector<8x8xf32> -> vector<8x8xf32>
    %c0_40 = arith.constant 0 : index
    %c2_41 = arith.constant 2 : index
    %c0_42 = arith.constant 0 : index
    %c0_43 = arith.constant 0 : index
    %c0_44 = arith.constant 0 : index
    %36 = vector.load %arg4[%c0_40, %c2_41, %c0_42, %c0_43, %c0_44] : memref<1x4x4x8x8xf32, #tpu.memory_space<vmem>>, vector<1x1x1x8x8xf32>
    %37 = vector.shape_cast %36 : vector<1x1x1x8x8xf32> to vector<8x8xf32>
    %38 = vector.shape_cast %35 : vector<8x8xf32> to vector<1x1x1x8x8xf32>
    tpu.vector_store %arg4[%c0_40, %c2_41, %c0_42, %c0_43, %c0_44], %38 {strides = array<i32>} : memref<1x4x4x8x8xf32, #tpu.memory_space<vmem>>, vector<1x1x1x8x8xf32>,
    %c0_45 = arith.constant 0 : index
    %c2_46 = arith.constant 2 : index
    %c0_47 = arith.constant 0 : index
    %c16_48 = arith.constant 16 : index
    %39 = vector.load %arg3[%c0_45, %c2_46, %c0_47, %c16_48] : memref<1x4x8x32xf32, #tpu.memory_space<vmem>>, vector<1x1x8x16xf32>
    %40 = vector.shape_cast %39 : vector<1x1x8x16xf32> to vector<8x16xf32>
    %cst_49 = arith.constant dense<0.000000e+00> : vector<8x8xf32>
    %41 = tpu.matmul %40, %8, %cst_49 {dimension_numbers = #tpu.dot_dimension_numbers<[1], [0], [0], [1], [0, 0, 1, 1], [], []>, precision = #tpu.contract_precision<fp32>} : vector<8x16xf32>, vector<16x8xf32>, vector<8x8xf32> -> vector<8x8xf32>
    %c0_50 = arith.constant 0 : index
    %c2_51 = arith.constant 2 : index
    %c2_52 = arith.constant 2 : index
    %c0_53 = arith.constant 0 : index
    %c0_54 = arith.constant 0 : index
    %42 = vector.load %arg4[%c0_50, %c2_51, %c2_52, %c0_53, %c0_54] : memref<1x4x4x8x8xf32, #tpu.memory_space<vmem>>, vector<1x1x1x8x8xf32>
    %43 = vector.shape_cast %42 : vector<1x1x1x8x8xf32> to vector<8x8xf32>
    %44 = vector.shape_cast %41 : vector<8x8xf32> to vector<1x1x1x8x8xf32>
    tpu.vector_store %arg4[%c0_50, %c2_51, %c2_52, %c0_53, %c0_54], %44 {strides = array<i32>} : memref<1x4x4x8x8xf32, #tpu.memory_space<vmem>>, vector<1x1x1x8x8xf32>,
    %c0_55 = arith.constant 0 : index
    %c3 = arith.constant 3 : index
    %c0_56 = arith.constant 0 : index
    %c0_57 = arith.constant 0 : index
    %45 = vector.load %arg3[%c0_55, %c3, %c0_56, %c0_57] : memref<1x4x8x32xf32, #tpu.memory_space<vmem>>, vector<1x1x8x16xf32>
    %46 = vector.shape_cast %45 : vector<1x1x8x16xf32> to vector<8x16xf32>
    %cst_58 = arith.constant dense<0.000000e+00> : vector<8x8xf32>
    %47 = tpu.matmul %46, %8, %cst_58 {dimension_numbers = #tpu.dot_dimension_numbers<[1], [0], [0], [1], [0, 0, 1, 1], [], []>, precision = #tpu.contract_precision<fp32>} : vector<8x16xf32>, vector<16x8xf32>, vector<8x8xf32> -> vector<8x8xf32>
    %c0_59 = arith.constant 0 : index
    %c3_60 = arith.constant 3 : index
    %c0_61 = arith.constant 0 : index
    %c0_62 = arith.constant 0 : index
    %c0_63 = arith.constant 0 : index
    %48 = vector.load %arg4[%c0_59, %c3_60, %c0_61, %c0_62, %c0_63] : memref<1x4x4x8x8xf32, #tpu.memory_space<vmem>>, vector<1x1x1x8x8xf32>
    %49 = vector.shape_cast %48 : vector<1x1x1x8x8xf32> to vector<8x8xf32>
    %50 = vector.shape_cast %47 : vector<8x8xf32> to vector<1x1x1x8x8xf32>
    tpu.vector_store %arg4[%c0_59, %c3_60, %c0_61, %c0_62, %c0_63], %50 {strides = array<i32>} : memref<1x4x4x8x8xf32, #tpu.memory_space<vmem>>, vector<1x1x1x8x8xf32>,
    %c0_64 = arith.constant 0 : index
    %c3_65 = arith.constant 3 : index
    %c0_66 = arith.constant 0 : index
    %c16_67 = arith.constant 16 : index
    %51 = vector.load %arg3[%c0_64, %c3_65, %c0_66, %c16_67] : memref<1x4x8x32xf32, #tpu.memory_space<vmem>>, vector<1x1x8x16xf32>
    %52 = vector.shape_cast %51 : vector<1x1x8x16xf32> to vector<8x16xf32>
    %cst_68 = arith.constant dense<0.000000e+00> : vector<8x8xf32>
    %53 = tpu.matmul %52, %8, %cst_68 {dimension_numbers = #tpu.dot_dimension_numbers<[1], [0], [0], [1], [0, 0, 1, 1], [], []>, precision = #tpu.contract_precision<fp32>} : vector<8x16xf32>, vector<16x8xf32>, vector<8x8xf32> -> vector<8x8xf32>
    %c0_69 = arith.constant 0 : index
    %c3_70 = arith.constant 3 : index
    %c2_71 = arith.constant 2 : index
    %c0_72 = arith.constant 0 : index
    %c0_73 = arith.constant 0 : index
    %54 = vector.load %arg4[%c0_69, %c3_70, %c2_71, %c0_72, %c0_73] : memref<1x4x4x8x8xf32, #tpu.memory_space<vmem>>, vector<1x1x1x8x8xf32>
    %55 = vector.shape_cast %54 : vector<1x1x1x8x8xf32> to vector<8x8xf32>
    %56 = vector.shape_cast %53 : vector<8x8xf32> to vector<1x1x1x8x8xf32>
    tpu.vector_store %arg4[%c0_69, %c3_70, %c2_71, %c0_72, %c0_73], %56 {strides = array<i32>} : memref<1x4x4x8x8xf32, #tpu.memory_space<vmem>>, vector<1x1x1x8x8xf32>,
    %57 = tpu.iota {dimensions = array<i32: 0>} : vector<16x8xi32>
    %58 = tpu.iota {dimensions = array<i32: 1>} : vector<16x8xi32>
    %c2_i32_74 = arith.constant 2 : i32
    %59 = vector.broadcast %c2_i32_74 : i32 to vector<16x8xi32>
    %60 = arith.muli %58, %59 : vector<16x8xi32>
    %c1_i32 = arith.constant 1 : i32
    %61 = vector.broadcast %c1_i32 : i32 to vector<16x8xi32>
    %62 = arith.addi %60, %61 : vector<16x8xi32>
    %63 = arith.cmpi eq, %57, %62 : vector<16x8xi32>
    %64 = arith.extui %63 : vector<16x8xi1> to vector<16x8xi32>
    %65 = arith.sitofp %64 : vector<16x8xi32> to vector<16x8xf32>
    %c0_75 = arith.constant 0 : index
    %c0_76 = arith.constant 0 : index
    %c0_77 = arith.constant 0 : index
    %c0_78 = arith.constant 0 : index
    %66 = vector.load %arg3[%c0_75, %c0_76, %c0_77, %c0_78] : memref<1x4x8x32xf32, #tpu.memory_space<vmem>>, vector<1x1x8x16xf32>
    %67 = vector.shape_cast %66 : vector<1x1x8x16xf32> to vector<8x16xf32>
    %cst_79 = arith.constant dense<0.000000e+00> : vector<8x8xf32>
    %68 = tpu.matmul %67, %65, %cst_79 {dimension_numbers = #tpu.dot_dimension_numbers<[1], [0], [0], [1], [0, 0, 1, 1], [], []>, precision = #tpu.contract_precision<fp32>} : vector<8x16xf32>, vector<16x8xf32>, vector<8x8xf32> -> vector<8x8xf32>
    %c0_80 = arith.constant 0 : index
    %c0_81 = arith.constant 0 : index
    %c1_82 = arith.constant 1 : index
    %c0_83 = arith.constant 0 : index
    %c0_84 = arith.constant 0 : index
    %69 = vector.load %arg4[%c0_80, %c0_81, %c1_82, %c0_83, %c0_84] : memref<1x4x4x8x8xf32, #tpu.memory_space<vmem>>, vector<1x1x1x8x8xf32>
    %70 = vector.shape_cast %69 : vector<1x1x1x8x8xf32> to vector<8x8xf32>
    %71 = vector.shape_cast %68 : vector<8x8xf32> to vector<1x1x1x8x8xf32>
    tpu.vector_store %arg4[%c0_80, %c0_81, %c1_82, %c0_83, %c0_84], %71 {strides = array<i32>} : memref<1x4x4x8x8xf32, #tpu.memory_space<vmem>>, vector<1x1x1x8x8xf32>,
    %c0_85 = arith.constant 0 : index
    %c0_86 = arith.constant 0 : index
    %c0_87 = arith.constant 0 : index
    %c16_88 = arith.constant 16 : index
    %72 = vector.load %arg3[%c0_85, %c0_86, %c0_87, %c16_88] : memref<1x4x8x32xf32, #tpu.memory_space<vmem>>, vector<1x1x8x16xf32>
    %73 = vector.shape_cast %72 : vector<1x1x8x16xf32> to vector<8x16xf32>
    %cst_89 = arith.constant dense<0.000000e+00> : vector<8x8xf32>
    %74 = tpu.matmul %73, %65, %cst_89 {dimension_numbers = #tpu.dot_dimension_numbers<[1], [0], [0], [1], [0, 0, 1, 1], [], []>, precision = #tpu.contract_precision<fp32>} : vector<8x16xf32>, vector<16x8xf32>, vector<8x8xf32> -> vector<8x8xf32>
    %c0_90 = arith.constant 0 : index
    %c0_91 = arith.constant 0 : index
    %c3_92 = arith.constant 3 : index
    %c0_93 = arith.constant 0 : index
    %c0_94 = arith.constant 0 : index
    %75 = vector.load %arg4[%c0_90, %c0_91, %c3_92, %c0_93, %c0_94] : memref<1x4x4x8x8xf32, #tpu.memory_space<vmem>>, vector<1x1x1x8x8xf32>
    %76 = vector.shape_cast %75 : vector<1x1x1x8x8xf32> to vector<8x8xf32>
    %77 = vector.shape_cast %74 : vector<8x8xf32> to vector<1x1x1x8x8xf32>
    tpu.vector_store %arg4[%c0_90, %c0_91, %c3_92, %c0_93, %c0_94], %77 {strides = array<i32>} : memref<1x4x4x8x8xf32, #tpu.memory_space<vmem>>, vector<1x1x1x8x8xf32>,
    %c0_95 = arith.constant 0 : index
    %c1_96 = arith.constant 1 : index
    %c0_97 = arith.constant 0 : index
    %c0_98 = arith.constant 0 : index
    %78 = vector.load %arg3[%c0_95, %c1_96, %c0_97, %c0_98] : memref<1x4x8x32xf32, #tpu.memory_space<vmem>>, vector<1x1x8x16xf32>
    %79 = vector.shape_cast %78 : vector<1x1x8x16xf32> to vector<8x16xf32>
    %cst_99 = arith.constant dense<0.000000e+00> : vector<8x8xf32>
    %80 = tpu.matmul %79, %65, %cst_99 {dimension_numbers = #tpu.dot_dimension_numbers<[1], [0], [0], [1], [0, 0, 1, 1], [], []>, precision = #tpu.contract_precision<fp32>} : vector<8x16xf32>, vector<16x8xf32>, vector<8x8xf32> -> vector<8x8xf32>
    %c0_100 = arith.constant 0 : index
    %c1_101 = arith.constant 1 : index
    %c1_102 = arith.constant 1 : index
    %c0_103 = arith.constant 0 : index
    %c0_104 = arith.constant 0 : index
    %81 = vector.load %arg4[%c0_100, %c1_101, %c1_102, %c0_103, %c0_104] : memref<1x4x4x8x8xf32, #tpu.memory_space<vmem>>, vector<1x1x1x8x8xf32>
    %82 = vector.shape_cast %81 : vector<1x1x1x8x8xf32> to vector<8x8xf32>
    %83 = vector.shape_cast %80 : vector<8x8xf32> to vector<1x1x1x8x8xf32>
    tpu.vector_store %arg4[%c0_100, %c1_101, %c1_102, %c0_103, %c0_104], %83 {strides = array<i32>} : memref<1x4x4x8x8xf32, #tpu.memory_space<vmem>>, vector<1x1x1x8x8xf32>,
    %c0_105 = arith.constant 0 : index
    %c1_106 = arith.constant 1 : index
    %c0_107 = arith.constant 0 : index
    %c16_108 = arith.constant 16 : index
    %84 = vector.load %arg3[%c0_105, %c1_106, %c0_107, %c16_108] : memref<1x4x8x32xf32, #tpu.memory_space<vmem>>, vector<1x1x8x16xf32>
    %85 = vector.shape_cast %84 : vector<1x1x8x16xf32> to vector<8x16xf32>
    %cst_109 = arith.constant dense<0.000000e+00> : vector<8x8xf32>
    %86 = tpu.matmul %85, %65, %cst_109 {dimension_numbers = #tpu.dot_dimension_numbers<[1], [0], [0], [1], [0, 0, 1, 1], [], []>, precision = #tpu.contract_precision<fp32>} : vector<8x16xf32>, vector<16x8xf32>, vector<8x8xf32> -> vector<8x8xf32>
    %c0_110 = arith.constant 0 : index
    %c1_111 = arith.constant 1 : index
    %c3_112 = arith.constant 3 : index
    %c0_113 = arith.constant 0 : index
    %c0_114 = arith.constant 0 : index
    %87 = vector.load %arg4[%c0_110, %c1_111, %c3_112, %c0_113, %c0_114] : memref<1x4x4x8x8xf32, #tpu.memory_space<vmem>>, vector<1x1x1x8x8xf32>
    %88 = vector.shape_cast %87 : vector<1x1x1x8x8xf32> to vector<8x8xf32>
    %89 = vector.shape_cast %86 : vector<8x8xf32> to vector<1x1x1x8x8xf32>
    tpu.vector_store %arg4[%c0_110, %c1_111, %c3_112, %c0_113, %c0_114], %89 {strides = array<i32>} : memref<1x4x4x8x8xf32, #tpu.memory_space<vmem>>, vector<1x1x1x8x8xf32>,
    %c0_115 = arith.constant 0 : index
    %c2_116 = arith.constant 2 : index
    %c0_117 = arith.constant 0 : index
    %c0_118 = arith.constant 0 : index
    %90 = vector.load %arg3[%c0_115, %c2_116, %c0_117, %c0_118] : memref<1x4x8x32xf32, #tpu.memory_space<vmem>>, vector<1x1x8x16xf32>
    %91 = vector.shape_cast %90 : vector<1x1x8x16xf32> to vector<8x16xf32>
    %cst_119 = arith.constant dense<0.000000e+00> : vector<8x8xf32>
    %92 = tpu.matmul %91, %65, %cst_119 {dimension_numbers = #tpu.dot_dimension_numbers<[1], [0], [0], [1], [0, 0, 1, 1], [], []>, precision = #tpu.contract_precision<fp32>} : vector<8x16xf32>, vector<16x8xf32>, vector<8x8xf32> -> vector<8x8xf32>
    %c0_120 = arith.constant 0 : index
    %c2_121 = arith.constant 2 : index
    %c1_122 = arith.constant 1 : index
    %c0_123 = arith.constant 0 : index
    %c0_124 = arith.constant 0 : index
    %93 = vector.load %arg4[%c0_120, %c2_121, %c1_122, %c0_123, %c0_124] : memref<1x4x4x8x8xf32, #tpu.memory_space<vmem>>, vector<1x1x1x8x8xf32>
    %94 = vector.shape_cast %93 : vector<1x1x1x8x8xf32> to vector<8x8xf32>
    %95 = vector.shape_cast %92 : vector<8x8xf32> to vector<1x1x1x8x8xf32>
    tpu.vector_store %arg4[%c0_120, %c2_121, %c1_122, %c0_123, %c0_124], %95 {strides = array<i32>} : memref<1x4x4x8x8xf32, #tpu.memory_space<vmem>>, vector<1x1x1x8x8xf32>,
    %c0_125 = arith.constant 0 : index
    %c2_126 = arith.constant 2 : index
    %c0_127 = arith.constant 0 : index
    %c16_128 = arith.constant 16 : index
    %96 = vector.load %arg3[%c0_125, %c2_126, %c0_127, %c16_128] : memref<1x4x8x32xf32, #tpu.memory_space<vmem>>, vector<1x1x8x16xf32>
    %97 = vector.shape_cast %96 : vector<1x1x8x16xf32> to vector<8x16xf32>
    %cst_129 = arith.constant dense<0.000000e+00> : vector<8x8xf32>
    %98 = tpu.matmul %97, %65, %cst_129 {dimension_numbers = #tpu.dot_dimension_numbers<[1], [0], [0], [1], [0, 0, 1, 1], [], []>, precision = #tpu.contract_precision<fp32>} : vector<8x16xf32>, vector<16x8xf32>, vector<8x8xf32> -> vector<8x8xf32>
    %c0_130 = arith.constant 0 : index
    %c2_131 = arith.constant 2 : index
    %c3_132 = arith.constant 3 : index
    %c0_133 = arith.constant 0 : index
    %c0_134 = arith.constant 0 : index
    %99 = vector.load %arg4[%c0_130, %c2_131, %c3_132, %c0_133, %c0_134] : memref<1x4x4x8x8xf32, #tpu.memory_space<vmem>>, vector<1x1x1x8x8xf32>
    %100 = vector.shape_cast %99 : vector<1x1x1x8x8xf32> to vector<8x8xf32>
    %101 = vector.shape_cast %98 : vector<8x8xf32> to vector<1x1x1x8x8xf32>
    tpu.vector_store %arg4[%c0_130, %c2_131, %c3_132, %c0_133, %c0_134], %101 {strides = array<i32>} : memref<1x4x4x8x8xf32, #tpu.memory_space<vmem>>, vector<1x1x1x8x8xf32>,
    %c0_135 = arith.constant 0 : index
    %c3_136 = arith.constant 3 : index
    %c0_137 = arith.constant 0 : index
    %c0_138 = arith.constant 0 : index
    %102 = vector.load %arg3[%c0_135, %c3_136, %c0_137, %c0_138] : memref<1x4x8x32xf32, #tpu.memory_space<vmem>>, vector<1x1x8x16xf32>
    %103 = vector.shape_cast %102 : vector<1x1x8x16xf32> to vector<8x16xf32>
    %cst_139 = arith.constant dense<0.000000e+00> : vector<8x8xf32>
    %104 = tpu.matmul %103, %65, %cst_139 {dimension_numbers = #tpu.dot_dimension_numbers<[1], [0], [0], [1], [0, 0, 1, 1], [], []>, precision = #tpu.contract_precision<fp32>} : vector<8x16xf32>, vector<16x8xf32>, vector<8x8xf32> -> vector<8x8xf32>
    %c0_140 = arith.constant 0 : index
    %c3_141 = arith.constant 3 : index
    %c1_142 = arith.constant 1 : index
    %c0_143 = arith.constant 0 : index
    %c0_144 = arith.constant 0 : index
    %105 = vector.load %arg4[%c0_140, %c3_141, %c1_142, %c0_143, %c0_144] : memref<1x4x4x8x8xf32, #tpu.memory_space<vmem>>, vector<1x1x1x8x8xf32>
    %106 = vector.shape_cast %105 : vector<1x1x1x8x8xf32> to vector<8x8xf32>
    %107 = vector.shape_cast %104 : vector<8x8xf32> to vector<1x1x1x8x8xf32>
    tpu.vector_store %arg4[%c0_140, %c3_141, %c1_142, %c0_143, %c0_144], %107 {strides = array<i32>} : memref<1x4x4x8x8xf32, #tpu.memory_space<vmem>>, vector<1x1x1x8x8xf32>,
    %c0_145 = arith.constant 0 : index
    %c3_146 = arith.constant 3 : index
    %c0_147 = arith.constant 0 : index
    %c16_148 = arith.constant 16 : index
    %108 = vector.load %arg3[%c0_145, %c3_146, %c0_147, %c16_148] : memref<1x4x8x32xf32, #tpu.memory_space<vmem>>, vector<1x1x8x16xf32>
    %109 = vector.shape_cast %108 : vector<1x1x8x16xf32> to vector<8x16xf32>
    %cst_149 = arith.constant dense<0.000000e+00> : vector<8x8xf32>
    %110 = tpu.matmul %109, %65, %cst_149 {dimension_numbers = #tpu.dot_dimension_numbers<[1], [0], [0], [1], [0, 0, 1, 1], [], []>, precision = #tpu.contract_precision<fp32>} : vector<8x16xf32>, vector<16x8xf32>, vector<8x8xf32> -> vector<8x8xf32>
    %c0_150 = arith.constant 0 : index
    %c3_151 = arith.constant 3 : index
    %c3_152 = arith.constant 3 : index
    %c0_153 = arith.constant 0 : index
    %c0_154 = arith.constant 0 : index
    %111 = vector.load %arg4[%c0_150, %c3_151, %c3_152, %c0_153, %c0_154] : memref<1x4x4x8x8xf32, #tpu.memory_space<vmem>>, vector<1x1x1x8x8xf32>
    %112 = vector.shape_cast %111 : vector<1x1x1x8x8xf32> to vector<8x8xf32>
    %113 = vector.shape_cast %110 : vector<8x8xf32> to vector<1x1x1x8x8xf32>
    tpu.vector_store %arg4[%c0_150, %c3_151, %c3_152, %c0_153, %c0_154], %113 {strides = array<i32>} : memref<1x4x4x8x8xf32, #tpu.memory_space<vmem>>, vector<1x1x1x8x8xf32>,
    return
  }
  func.func @transform_0(%arg0: i32, %arg1: i32, %arg2: i32) -> (i32, i32, i32, i32) {
    %c0_i32 = arith.constant 0 : i32
    %c0_i32_0 = arith.constant 0 : i32
    return %arg0, %arg1, %arg2, %c0_i32 : i32, i32, i32, i32
  }
  func.func @transform_1(%arg0: i32, %arg1: i32, %arg2: i32) -> (i32, i32, i32, i32, i32) {
    %c0_i32 = arith.constant 0 : i32
    %c0_i32_0 = arith.constant 0 : i32
    %c0_i32_1 = arith.constant 0 : i32
    return %arg0, %arg1, %c0_i32, %arg2, %c0_i32_0 : i32, i32, i32, i32, i32
  }
}

</mosaic_0001>

<bundles_post_ra>
// kernel: tpu_custom_call.1
= control target key start
LH: loop header
LB: loop body
LE: loop exit
PB: predicated region body
PF: predicated region fallthrough
CT: control target
= control target key end

     0   :  { %6 = vsyncpa [#allocation3], 0  ;;  %s4060_s0 = inlined_call_operand.hbm [shape: f32[2,4,8,32], index: 0, kind: input, shape index: {}]   ;;  %s4061_s1 = inlined_call_operand.hbm [shape: f32[2,4,4,8,8], index: 1, kind: output, shape index: {}]  }
   0x1   :  { %8 = vsyncpa [#allocation3 + $0x1], 0 }
   0x2   :  { %9 = vsyncpa [#allocation4], 0 }
   0x3   :  { %11 = vsyncpa [#allocation4 + $0x1], 0  ;;  %s3304_s6 = smov 0   ;;  %s3306_s7 = smov 0  }
   0x4   :  { %s3308_s8 = smov 0   ;;  %s3310_s9 = smov 0  }
   0x5   :  { %s3312_s10 = smov 0   ;;  %s3314_s11 = smov 0  }
   0x6 LB: > { %s2960_s12 = sadd.s32 4294967295, %s3285_s11   ;;  %s2961_s13 = sadd.s32 4294967294, %s3285_s11   ;;  %s3285_s11 = sphi %s3314_s11, %s17_s11   ;;  %s3281_s10 = sphi %s3312_s10, %s4078_s10   ;;  %s3277_s9 = sphi %s3310_s9, %s4077_s9   ;;  %s3273_s8 = sphi %s3308_s8, %s4076_s8   ;;  %s3269_s7 = sphi %s3306_s7, %s4075_s7   ;;  %s3265_s6 = sphi %s3304_s6, %s4074_s6  }
   0x7   : > { %s36_s14 = sadd.s32 1, %s3281_s10  ;;  %s47_s15 = sadd.s32 1, %s3273_s8 }
   0x8   : > { %p38_p0 = scmp.ge.s32.totalorder %s36_s14, 2  ;;  %p54_p1 = scmp.ne.s32.totalorder %s3273_s8, %s3269_s7 }
   0x9   : > { %p55_p2 = scmp.eq.s32.totalorder %s3285_s11, 0  ;;  %p60_p3 = scmp.ne.s32.totalorder %s3269_s7, %s3265_s6 }
   0xa   : > { %s4080_s14 = smov (%p38_p0, %s36_s14), 0  ;;  %p61_p5 = scmp.eq.s32.totalorder %s2960_s12, 0 }
   0xb   : > { %p3345_p4 = por %p55_p2, %p54_p1  ;;  %s40_s17 = ssub.s32 %s3281_s10, %s4080_s14 }
   0xc   : > { %p88_p6 = scmp.eq.s32.totalorder %s2960_s12, 1  ;;  %p45_p7 = scmp.eq.s32.totalorder %s40_s17, 0 }
   0xd   : > { %p3351_p8 = por %p61_p5, %p60_p3  ;;  %p94_p10 = scmp.eq.s32.totalorder %s2961_s13, 1 }
   0xe   : > { %p3355_p9 = por %p88_p6, %p54_p1  ;;  %p2963_p12 = scmp.ge.s32.totalorder %s3285_s11, 2 }
   0xf   : > { %s3360_s20 = scalar_select %p45_p7, %s3273_s8, %s47_s15  }
  0x10   : > { %p3362_p11 = por %p94_p10, %p60_p3  ;;  %p3116_p13 = scmp.lt.s32.totalorder %s3285_s11, 2 }
  0x11   : > { %s114_s22 = sand.u32 1, %s3273_s8   ;;  %s3102_s24 = sshll.u32 %s3281_s10, 5 }
  0x12   : > { %s2964_s23 = sshll.u32 %s114_s22, 5  ;;  %s126_s27 = scalar_lea.hbm %s4060_s0, %s3102_s24 }
  0x13   : > { %s118_s28 = scalar_lea.vmem [#allocation2], %s2964_s23  ;;  %s127_s30 = sshll.u32 %s126_s27, 4  ;;  %s128_s30 = int_to_ptr.hbm [resolvable:$true] %s127_s30 }
  0x14   : > { %s129_s29 = sshll.u32 %s118_s28, 4  ;;  %p3109_p0 = pnand %p3116_p13, %p3345_p4  ;;  %s130_s29 = int_to_ptr.vmem [resolvable:$true] %s129_s29 }
  0x15   : > { %p2967_p1 = scmp.ge.s32.totalorder %s3285_s11, 1  ;;  %s115_s2 = scalar_lea.sflag [#allocation3], %s114_s22 }
  0x16   : > { %s3287_s3 = smov 128   ;;  %s3288_s4 = smov 8  }
  0x17   : > { %3111 = dma.hbm_to_vmem [thread:$0]  (!%p3109_p0), %s128_s30, 512, %s130_s29, %s115_s2, %s3287_s3, %s3287_s3, %s3288_s4  }
  0x18   : > { %p137_p2 = scmp.lt.s32.totalorder %s3285_s11, 3 }
  0x1a   : > { %p138_p3 = pnand %p2967_p1, %p137_p2 }
  0x1b   : > { %s3378_s5 = sand.u32 (!%p138_p3), 1, %s3269_s7  }
  0x1c   : > { %141 = sbr.rel (%p138_p3) target bundleno = 478 (0x1de), region = 24  ;;  %s2968_s12 = sshll.u32 (!%p138_p3), %s3378_s5, 5 }
  0x1d   : > { %s144_s13 = scalar_lea.sflag (!%p138_p3), [#allocation3], %s3378_s5  ;;  %s3382_s15 = scalar_lea.vmem (!%p138_p3), [#allocation2], %s2968_s12 }
  0x21   : > { %3256 = dma.done.wait (%p3351_p8), %s144_s13, 512  }
  0x22   : > { %3258 = vsyncadd (%p3351_p8), %s144_s13, 4294966784  ;;  %v169_v0 = vlaneseq  ;;  %vm182_vm0 = vcmask 130048   ;;  %v347_v7 = vld [vmem:[%s3382_s15] sm:$0xff]  ;;  %v3409_v8 = vld [vmem:[%s3382_s15 + $0x10] sm:$0xff]  ;;  %v3289_v9 = vmov 1.0   ;;  %v3290_v10 = vmov 0.0  }
  0x23   : > { %s3291_s16 = smov 112   ;;  %v184_v14 = vsel %vm182_vm0, %v347_v7, 0  ;;  %v2993_v22 = vld [vmem:[%s3382_s15 + $0x8] sm:$0xff]  ;;  %v3458_v23 = vld [vmem:[%s3382_s15 + $0x18] sm:$0xff]  ;;  %v850_v44 = vsel %vm182_vm0, %v3409_v8, 0  ;;  %s2969_s17 = sshll.u32 %s3378_s5, 7 }
  0x24   : > { %v3388_v1 = vshrl.u32 %v169_v0, 7  ;;  %v173_v2 = vand.u32 127, %v169_v0  ;;  %349 = vrot.lane.b32.xlu0 %v347_v7, %s3291_s16  ;;  %1015 = vrot.lane.b32.xlu1 %v3409_v8, %s3291_s16  ;;  %v3434_v16 = vand.u32 4294901760, %v184_v14  ;;  %v517_v29 = vsel %vm182_vm0, %v2993_v22, 0  ;;  %s3840_s18 = scalar_lea.vmem [#allocation5], %s2969_s17  ;;  %s3103_s22 = sshll.u32 %s3277_s9, 7 }
  0x25   : > { %1687 = vrot.lane.b32.xlu2 %v347_v7, %s3291_s16  ;;  %v3527_v30 = vand.u32 4294901760, %v517_v29  ;;  %v3568_v46 = vand.u32 4294901760, %v850_v44  ;;  %v1183_v57 = vsel %vm182_vm0, %v3458_v23, 0  ;;  %vm345_vm5 = vcmask 64512   ;;  %s2864_s25 = scalar_lea.hbm %s4061_s1, %s3103_s22  ;;  %s2865_s26 = sshll.u32 %s3840_s18, 4  ;;  %s2866_s26 = int_to_ptr.vmem [resolvable:$true] %s2865_s26 }
  0x26   : > { %v3391_v3 = vadd.s32 8, %v3388_v1  ;;  %v3393_v4 = vmul.u32 2, %v173_v2  ;;  %v3448_v19 = vsub.f32 %v184_v14, %v3434_v16  ;;  %v3637_v59 = vand.u32 4294901760, %v1183_v57  ;;  %s2867_s27 = sshll.u32 %s2864_s25, 4  ;;  %s2849_s9 = scalar_lea.sflag [#allocation4], %s3378_s5  ;;  %s2868_s27 = int_to_ptr.hbm [resolvable:$true] %s2867_s27 }
  0x27   : > { %v3530_v31 = vsub.f32 %v517_v29, %v3527_v30  ;;  %v3582_v48 = vsub.f32 %v850_v44, %v3568_v46  ;;  %s3217_s28 = sshra.s32 %s2868_s27, 4  ;;  %s3223_s3 = scalar_lea.hbm %s4061_s1, 256  ;;  %s3218_s28 = int_to_ptr.hbm [resolvable:$true] %s3217_s28 }
  0x28   : > { %vm3397_vm1 = vcmp.eq.s32.totalorder %v3391_v3, %v3393_v4  ;;  %vm3403_vm2 = vcmp.eq.s32.totalorder %v3388_v1, %v3393_v4  ;;  %v3461_v24 = vand.u32 4294901760, %v3448_v19  ;;  %v3651_v61 = vsub.f32 %v1183_v57, %v3637_v59  ;;  %s3219_s29 = scalar_lea.hbm %s3218_s28, 128  ;;  %p3224_p7 = scmp.lt.s32.totalorder %s3218_s28, %s4061_s1 }
  0x29   : > { %2972 = vmatpush.msk.msra.mxu0 %vm3397_vm1, %v3289_v9  ;;  %v2971_v11 = vsel %vm3397_vm1, 1.0, %v3290_v10  ;;  %v2970_v12 = vsel %vm3403_vm2, 1.0, %v3290_v10  ;;  %2974 = vmatpush.msk.msra.mxu3 %vm3397_vm1, %v3289_v9  ;;  %v3534_v35 = vand.u32 4294901760, %v3530_v31  ;;  %v3599_v50 = vand.u32 4294901760, %v3582_v48  ;;  %p3220_p4 = scmp.ne.s32.totalorder %s3218_s28, %s3219_s29  ;;  %p3225_p8 = scmp.lt.s32.totalorder %s3223_s3, %s3219_s29 }
  0x2a   : > { %v3426_v13 = vsub.f32 %v2971_v11, %v2971_v11  ;;  %v3429_v15 = vsub.f32 %v2970_v12, %v2970_v12  ;;  %v207_v26 = vsub.f32 %v3448_v19, %v3461_v24  ;;  %v1513_v62 = vadd.s32 1, %v3393_v4 }
  0x2b   : > { %2973 = vmatpush.msk.msra.mxu0 %vm3403_vm2, %v3289_v9  ;;  %2975 = vmatpush.msk.msra.mxu3 %vm3403_vm2, %v3289_v9  ;;  %v540_v38 = vsub.f32 %v3530_v31, %v3534_v35  ;;  %v873_v52 = vsub.f32 %v3582_v48, %v3599_v50  ;;  %v3669_v0 = vand.u32 4294901760, %v3651_v61  ;;  %p3221_p5 = pnand %p3220_p4, %p3355_p9  ;;  %p3226_p10 = por %p3225_p8, %p3224_p7 }
  0x2c   : > { %v3440_v17 = vand.u32 4294901760, %v3426_v13  ;;  %v3443_v18 = vand.u32 4294901760, %v3429_v15  ;;  %260 = vmatpush.msra.mxu2 %v3426_v13  ;;  %291 = vmatmul.f32.vlgmr.msra.gmra.mxu3 %v3461_v24  ;;  %v3479_v28 = vand.u32 4294901760, %v207_v26  ;;  %vm3673_vm3 = vcmp.eq.s32.totalorder %v3391_v3, %v1513_v62 }
  0x2d   : > { %682 = vrot.lane.b32.xlu0 %v2993_v22, %s3291_s16  ;;  %1348 = vrot.lane.b32.xlu1 %v3458_v23, %s3291_s16  ;;  %v3549_v41 = vand.u32 4294901760, %v540_v38  ;;  %v3617_v54 = vand.u32 4294901760, %v873_v52  ;;  %vm3683_vm4 = vcmp.eq.s32.totalorder %v3388_v1, %v1513_v62  ;;  %v1206_v3 = vsub.f32 %v3651_v61, %v3669_v0  ;;  %p3222_p6 = pneg %p3221_p5 }
  0x2e   : > { %v230_v20 = vsub.f32 %v3426_v13, %v3440_v17  ;;  %v236_v21 = vsub.f32 %v3429_v15, %v3443_v18  ;;  %312 = vmatpush.msrb.mxu0 %v3440_v17  ;;  %263 = vmatpush.msra.mxu2 %v3429_v15  ;;  %v3033_v1 = vsel %vm3683_vm4, 1.0, %v3290_v10 }
  0x2f   : > { %266 = vmatmul.f32.vlgmr.msra.gmra.mxu2 %v3448_v19  ;;  %2019 = vrot.lane.b32.xlu2 %v2993_v22, %s3291_s16  ;;  %v3705_v14 = vand.u32 4294901760, %v1206_v3  ;;  %p3227_p13 = pnand %p3226_p10, %p3222_p6 }
  0x30   : > { %v3464_v25 = vand.u32 4294901760, %v230_v20  ;;  %316 = vmatpush.msrb.mxu0 %v3443_v18  ;;  %2978 = vmatpush.msk.msrb.mxu2 %vm3397_vm1, %v3289_v9  ;;  %v3472_v27 = vand.u32 4294901760, %v236_v21  ;;  %v3711_v20 = vsub.f32 %v3033_v1, %v3033_v1 }
  0x31   : > { %209 = vmatmul.f32.vlgmr.msra.gmra.mxu0 %v3479_v28 }
  0x32   : > { %232 = vmatpush.msra.mxu1 %v3464_v25  ;;  %399 = vmatpush.msrb.mxu3 %v3464_v25 }
  0x33   : > { %2979 = vmatpush.msk.msrb.mxu2 %vm3403_vm2, %v3289_v9  ;;  %427 = vmatpush.msra.mxu0 %v3426_v13 }
  0x34   : > { %238 = vmatpush.msra.mxu1 %v3472_v27  ;;  %405 = vmatpush.msrb.mxu3 %v3472_v27 }
  0x35   : > { %240 = vmatmul.f32.vlgmr.msra.gmra.mxu1 %v3434_v16  ;;  %479 = vmatpush.msra.mxu2 %v3440_v17 }
  0x36   : > { %2976 = vmatpush.msk.msrb.mxu1 %vm3397_vm1, %v3289_v9  ;;  %2982 = vmatpush.msk.msra.mxu3 %vm3397_vm1, %v3289_v9 }
  0x37   : > { %430 = vmatpush.msra.mxu0 %v3429_v15  ;;  %483 = vmatpush.msra.mxu2 %v3443_v18 }
  0x38   : > { %2977 = vmatpush.msk.msrb.mxu1 %vm3403_vm2, %v3289_v9  ;;  %2983 = vmatpush.msk.msra.mxu3 %vm3403_vm2, %v3289_v9 }
  0x39   : > { %2351 = vrot.lane.b32.xlu0 %v3409_v8, %s3291_s16  ;;  %2683 = vrot.lane.b32.xlu1 %v3458_v23, %s3291_s16  ;;  %v3034_v8 = vsel %vm3673_vm3, 1.0, %v3290_v10  ;;  %v3723_v23 = vand.u32 4294901760, %v3711_v20 }
  0x3a   : > { %2980 = vmatpush.msk.msra.mxu1 %vm3397_vm1, %v3289_v9  ;;  %318 = vmatmul.f32.vlgmr.msrb.gmra.mxu0 %v3434_v16  ;;  %v3703_v11 = vsub.f32 %v3034_v8, %v3034_v8 }
  0x3b   : > { %2986 = vmatpush.msk.msrb.mxu0 %vm3397_vm1, %v3289_v9 }
  0x3c   : > { %2981 = vmatpush.msk.msra.mxu1 %vm3403_vm2, %v3289_v9  ;;  %v3716_v21 = vand.u32 4294901760, %v3703_v11 }
  0x3d   : > { %341 = vmatmul.f32.vlgmr.msrb.gmra.mxu1 %v3434_v16  ;;  %2987 = vmatpush.msk.msrb.mxu0 %vm3403_vm2, %v3289_v9 }
  0x3e   : > { %565 = vmatpush.msrb.mxu1 %v3464_v25 }
  0x40   : > { %571 = vmatpush.msrb.mxu1 %v3472_v27 }
  0x96   : > { %v350_v32 = vpop.permute.xlu0 %349  ;;  %v1016_v55 = vpop.permute.xlu1 %1015 }
  0x97   : > { %v351_v33 = vsel %vm182_vm0, %v350_v32, 0  ;;  %v1017_v56 = vsel %vm182_vm0, %v1016_v55, 0 }
  0x98   : > { %v371_v34 = vand.u32 4294901760, %v351_v33  ;;  %v1037_v58 = vand.u32 4294901760, %v1017_v56 }
  0x9a   : > { %v372_v36 = vsub.f32 %v351_v33, %v371_v34  ;;  %407 = vmatmul.f32.vlgmr.msrb.gmra.mxu3 %v371_v34  ;;  %v1038_v60 = vsub.f32 %v1017_v56, %v1037_v58 }
  0x9b   : > { %2988 = vmatpush.msk.msrb.mxu3 %vm3397_vm1, %v3289_v9 }
  0x9c   : > { %v373_v37 = vand.u32 4294901760, %v372_v36  ;;  %433 = vmatmul.f32.vlgmr.msra.gmra.mxu0 %v372_v36  ;;  %v1039_v63 = vand.u32 4294901760, %v1038_v60 }
  0x9d   : > { %2989 = vmatpush.msk.msrb.mxu3 %vm3403_vm2, %v3289_v9  ;;  %645 = vmatpush.msra.mxu0 %v3440_v17 }
  0x9e   : > { %458 = vmatmul.f32.vlgmr.msra.gmra.mxu1 %v373_v37  ;;  %v374_v39 = vsub.f32 %v372_v36, %v373_v37  ;;  %v1040_v7 = vsub.f32 %v1038_v60, %v1039_v63 }
  0x9f   : > { %649 = vmatpush.msra.mxu0 %v3443_v18  ;;  %2990 = vmatpush.msk.msra.mxu1 %vm3397_vm1, %v3289_v9  ;;  %v683_v42 = vpop.permute.xlu0 %682  ;;  %v1349_v10 = vpop.permute.xlu1 %1348 }
  0xa0   : > { %v375_v40 = vand.u32 4294901760, %v374_v39  ;;  %v684_v43 = vsel %vm182_vm0, %v683_v42, 0  ;;  %v1041_v12 = vand.u32 4294901760, %v1040_v7  ;;  %v1350_v22 = vsel %vm182_vm0, %v1349_v10, 0 }
  0xa1   : > { %2991 = vmatpush.msk.msra.mxu1 %vm3403_vm2, %v3289_v9  ;;  %v704_v45 = vand.u32 4294901760, %v684_v43  ;;  %v1370_v26 = vand.u32 4294901760, %v1350_v22 }
  0xa2   : > { %376 = vmatmul.f32.vlgmr.msrb.gmra.mxu2 %v375_v40  ;;  %508 = vmatmul.f32.vlgmr.msra.gmra.mxu3 %v371_v34 }
  0xa3   : > { %593 = vmatpush.msrb.mxu2 %v3426_v13  ;;  %732 = vmatpush.msra.mxu3 %v3464_v25  ;;  %v705_v47 = vsub.f32 %v684_v43, %v704_v45 }
  0xa4   : > { %542 = vmatmul.f32.vlgmr.msrb.gmra.mxu0 %v3549_v41 }
  0xa5   : > { %596 = vmatpush.msrb.mxu2 %v3429_v15  ;;  %738 = vmatpush.msra.mxu3 %v3472_v27  ;;  %v706_v49 = vand.u32 4294901760, %v705_v47 }
  0xa6   : > { %573 = vmatmul.f32.vlgmr.msrb.gmra.mxu1 %v3527_v30  ;;  %760 = vmatpush.msrb.mxu0 %v3426_v13 }
  0xa7   : > { %2996 = vmatpush.msk.msrb.mxu1 %vm3397_vm1, %v3289_v9  ;;  %v707_v51 = vsub.f32 %v705_v47, %v706_v49 }
  0xa8   : > { %763 = vmatpush.msrb.mxu0 %v3429_v15 }
  0xa9   : > { %2997 = vmatpush.msk.msrb.mxu1 %vm3403_vm2, %v3289_v9  ;;  %v708_v53 = vand.u32 4294901760, %v707_v51 }
  0xaa   : > { %485 = vmatmul.f32.vlgmr.msra.gmra.mxu2 %v371_v34  ;;  %624 = vmatmul.f32.vlgmr.msrb.gmra.mxu3 %v3534_v35 }
  0xab   : > { %2994 = vmatpush.msk.msra.mxu2 %vm3397_vm1, %v3289_v9  ;;  %2998 = vmatpush.msk.msrb.mxu3 %vm3397_vm1, %v3289_v9  ;;  %v2352_v55 = vpop.permute.xlu0 %2351 }
  0xac   : > { %651 = vmatmul.f32.vlgmr.msra.gmra.mxu0 %v3527_v30 }
  0xad   : > { %2995 = vmatpush.msk.msra.mxu2 %vm3403_vm2, %v3289_v9  ;;  %2999 = vmatpush.msk.msrb.mxu3 %vm3403_vm2, %v3289_v9 }
  0xae   : > { %674 = vmatmul.f32.vlgmr.msra.gmra.mxu1 %v3527_v30  ;;  %3002 = vmatpush.msk.msra.mxu0 %vm3397_vm1, %v3289_v9  ;;  %v210_v34 = vpop.f32.mrf.mxu0 }
  0xaf   : > { %898 = vmatpush.msra.mxu1 %v3464_v25  ;;  %v292_v40 = vpop.f32.mrf.mxu3 }
  0xb0   : > { %3003 = vmatpush.msk.msra.mxu0 %vm3403_vm2, %v3289_v9 }
  0xb1   : > { %904 = vmatpush.msra.mxu1 %v3472_v27 }
  0xb2   : > { %599 = vmatmul.f32.vlgmr.msrb.gmra.mxu2 %v3530_v31  ;;  %740 = vmatmul.f32.vlgmr.msra.gmra.mxu3 %v704_v45 }
  0xb3   : > { %812 = vmatpush.msrb.mxu2 %v3440_v17  ;;  %3004 = vmatpush.msk.msra.mxu3 %vm3397_vm1, %v3289_v9 }
  0xb4   : > { %766 = vmatmul.f32.vlgmr.msrb.gmra.mxu0 %v705_v47 }
  0xb5   : > { %816 = vmatpush.msrb.mxu2 %v3443_v18  ;;  %3005 = vmatpush.msk.msra.mxu3 %vm3403_vm2, %v3289_v9 }
  0xb6   : > { %791 = vmatmul.f32.vlgmr.msrb.gmra.mxu1 %v706_v49  ;;  %978 = vmatpush.msrb.mxu0 %v3440_v17 }
  0xb7   : > { %3006 = vmatpush.msk.msrb.mxu1 %vm3397_vm1, %v3289_v9  ;;  %v319_v42 = vpop.f32.mrf.mxu0 }
  0xb8   : > { %982 = vmatpush.msrb.mxu0 %v3443_v18 }
  0xb9   : > { %3007 = vmatpush.msk.msrb.mxu1 %vm3403_vm2, %v3289_v9 }
  0xba   : > { %709 = vmatmul.f32.vlgmr.msra.gmra.mxu2 %v708_v53  ;;  %841 = vmatmul.f32.vlgmr.msrb.gmra.mxu3 %v704_v45 }
  0xbb   : > { %926 = vmatpush.msra.mxu2 %v3426_v13  ;;  %1065 = vmatpush.msrb.mxu3 %v3464_v25 }
  0xbc   : > { %875 = vmatmul.f32.vlgmr.msra.gmra.mxu0 %v3617_v54 }
  0xbd   : > { %929 = vmatpush.msra.mxu2 %v3429_v15  ;;  %1071 = vmatpush.msrb.mxu3 %v3472_v27 }
  0xbe   : > { %906 = vmatmul.f32.vlgmr.msra.gmra.mxu1 %v3568_v46  ;;  %1093 = vmatpush.msra.mxu0 %v3426_v13 }
  0xbf   : > { %3012 = vmatpush.msk.msra.mxu1 %vm3397_vm1, %v3289_v9 }
  0xc0   : > { %1096 = vmatpush.msra.mxu0 %v3429_v15 }
  0xc1   : > { %3013 = vmatpush.msk.msra.mxu1 %vm3403_vm2, %v3289_v9 }
  0xc2   : > { %818 = vmatmul.f32.vlgmr.msrb.gmra.mxu2 %v704_v45  ;;  %957 = vmatmul.f32.vlgmr.msra.gmra.mxu3 %v3599_v50 }
  0xc3   : > { %3010 = vmatpush.msk.msrb.mxu2 %vm3397_vm1, %v3289_v9  ;;  %3014 = vmatpush.msk.msra.mxu3 %vm3397_vm1, %v3289_v9 }
  0xc4   : > { %984 = vmatmul.f32.vlgmr.msrb.gmra.mxu0 %v3568_v46 }
  0xc5   : > { %3011 = vmatpush.msk.msrb.mxu2 %vm3403_vm2, %v3289_v9  ;;  %3015 = vmatpush.msk.msra.mxu3 %vm3403_vm2, %v3289_v9 }
  0xc6   : > { %1007 = vmatmul.f32.vlgmr.msrb.gmra.mxu1 %v3568_v46  ;;  %3018 = vmatpush.msk.msrb.mxu0 %vm3397_vm1, %v3289_v9 }
  0xc7   : > { %1231 = vmatpush.msrb.mxu1 %v3464_v25 }
  0xc8   : > { %3019 = vmatpush.msk.msrb.mxu0 %vm3403_vm2, %v3289_v9 }
  0xc9   : > { %1237 = vmatpush.msrb.mxu1 %v3472_v27 }
  0xca   : > { %932 = vmatmul.f32.vlgmr.msra.gmra.mxu2 %v3582_v48  ;;  %1073 = vmatmul.f32.vlgmr.msrb.gmra.mxu3 %v1037_v58 }
  0xcb   : > { %1145 = vmatpush.msra.mxu2 %v3440_v17  ;;  %3020 = vmatpush.msk.msrb.mxu3 %vm3397_vm1, %v3289_v9 }
  0xcc   : > { %1099 = vmatmul.f32.vlgmr.msra.gmra.mxu0 %v1038_v60 }
  0xcd   : > { %1149 = vmatpush.msra.mxu2 %v3443_v18  ;;  %3021 = vmatpush.msk.msrb.mxu3 %vm3403_vm2, %v3289_v9 }
  0xce   : > { %1124 = vmatmul.f32.vlgmr.msra.gmra.mxu1 %v1039_v63  ;;  %1311 = vmatpush.msra.mxu0 %v3440_v17 }
  0xcf   : > { %3022 = vmatpush.msk.msra.mxu1 %vm3397_vm1, %v3289_v9 }
  0xd0   : > { %1315 = vmatpush.msra.mxu0 %v3443_v18 }
  0xd1   : > { %3023 = vmatpush.msk.msra.mxu1 %vm3403_vm2, %v3289_v9 }
  0xd2   : > { %1042 = vmatmul.f32.vlgmr.msrb.gmra.mxu2 %v1041_v12  ;;  %1174 = vmatmul.f32.vlgmr.msra.gmra.mxu3 %v1037_v58 }
  0xd3   : > { %1259 = vmatpush.msrb.mxu2 %v3426_v13  ;;  %1398 = vmatpush.msra.mxu3 %v3464_v25  ;;  %v1568_v25 = vsub.f32 %v3703_v11, %v3716_v21 }
  0xd4   : > { %1208 = vmatmul.f32.vlgmr.msrb.gmra.mxu0 %v3705_v14 }
  0xd5   : > { %1262 = vmatpush.msrb.mxu2 %v3429_v15  ;;  %1404 = vmatpush.msra.mxu3 %v3472_v27  ;;  %v1574_v27 = vsub.f32 %v3711_v20, %v3723_v23 }
  0xd6   : > { %1239 = vmatmul.f32.vlgmr.msrb.gmra.mxu1 %v3637_v59  ;;  %1426 = vmatpush.msrb.mxu0 %v3426_v13  ;;  %v3745_v13 = vand.u32 4294901760, %v1568_v25 }
  0xd7   : > { %3028 = vmatpush.msk.msrb.mxu1 %vm3397_vm1, %v3289_v9  ;;  %v3754_v29 = vand.u32 4294901760, %v1574_v27 }
  0xd8   : > { %1429 = vmatpush.msrb.mxu0 %v3429_v15  ;;  %v1371_v15 = vsub.f32 %v1350_v22, %v1370_v26 }
  0xd9   : > { %3029 = vmatpush.msk.msrb.mxu1 %vm3403_vm2, %v3289_v9 }
  0xda   : > { %1151 = vmatmul.f32.vlgmr.msra.gmra.mxu2 %v1037_v58  ;;  %1290 = vmatmul.f32.vlgmr.msrb.gmra.mxu3 %v3669_v0  ;;  %v1372_v5 = vand.u32 4294901760, %v1371_v15  ;;  %v2353_v58 = vsel %vm182_vm0, %v2352_v55, 0 }
  0xdb   : > { %3026 = vmatpush.msk.msra.mxu2 %vm3397_vm1, %v3289_v9  ;;  %3030 = vmatpush.msk.msrb.mxu3 %vm3397_vm1, %v3289_v9  ;;  %v3908_v60 = vand.u32 4294901760, %v2353_v58 }
  0xdc   : > { %1317 = vmatmul.f32.vlgmr.msra.gmra.mxu0 %v3637_v59  ;;  %v1373_v6 = vsub.f32 %v1371_v15, %v1372_v5 }
  0xdd   : > { %3027 = vmatpush.msk.msra.mxu2 %vm3403_vm2, %v3289_v9  ;;  %3031 = vmatpush.msk.msrb.mxu3 %vm3403_vm2, %v3289_v9  ;;  %v2374_v63 = vsub.f32 %v2353_v58, %v3908_v60 }
  0xde   : > { %1340 = vmatmul.f32.vlgmr.msra.gmra.mxu1 %v3637_v59  ;;  %3035 = vmatpush.msk.msra.mxu0 %vm3673_vm3, %v3289_v9 }
  0xdf   : > { %1570 = vmatpush.msra.mxu1 %v3745_v13  ;;  %v2375_v8 = vand.u32 4294901760, %v2374_v63 }
  0xe0   : > { %3036 = vmatpush.msk.msra.mxu0 %vm3683_vm4, %v3289_v9 }
  0xe1   : > { %1576 = vmatpush.msra.mxu1 %v3754_v29  ;;  %v2376_v10 = vsub.f32 %v2374_v63, %v2375_v8 }
  0xe2   : > { %1265 = vmatmul.f32.vlgmr.msrb.gmra.mxu2 %v3651_v61  ;;  %1406 = vmatmul.f32.vlgmr.msra.gmra.mxu3 %v1370_v26 }
  0xe3   : > { %1478 = vmatpush.msrb.mxu2 %v3440_v17  ;;  %3037 = vmatpush.msk.msra.mxu3 %vm3673_vm3, %v3289_v9  ;;  %v1374_v17 = vand.u32 4294901760, %v1373_v6  ;;  %v2377_v27 = vand.u32 4294901760, %v2376_v10  ;;  %v2684_v6 = vpop.permute.xlu1 %2683 }
  0xe4   : > { %1432 = vmatmul.f32.vlgmr.msrb.gmra.mxu0 %v1371_v15 }
  0xe5   : > { %1482 = vmatpush.msrb.mxu2 %v3443_v18  ;;  %3038 = vmatpush.msk.msra.mxu3 %vm3683_vm4, %v3289_v9  ;;  %v1688_v18 = vpop.permute.xlu2 %1687 }
  0xe6   : > { %1457 = vmatmul.f32.vlgmr.msrb.gmra.mxu1 %v1372_v5  ;;  %1650 = vmatpush.msrb.mxu0 %v3716_v21  ;;  %v1689_v32 = vsel %vm182_vm0, %v1688_v18, 0 }
  0xe7   : > { %3039 = vmatpush.msk.msrb.mxu1 %vm3673_vm3, %v3289_v9  ;;  %v1709_v33 = vand.u32 4294901760, %v1689_v32 }
  0xe8   : > { %1654 = vmatpush.msrb.mxu0 %v3723_v23 }
  0xe9   : > { %3040 = vmatpush.msk.msrb.mxu1 %vm3683_vm4, %v3289_v9 }
  0xea   : > { %1375 = vmatmul.f32.vlgmr.msra.gmra.mxu2 %v1374_v17  ;;  %1507 = vmatmul.f32.vlgmr.msrb.gmra.mxu3 %v1370_v26 }
  0xeb   : > { %1598 = vmatpush.msra.mxu2 %v3703_v11  ;;  %1737 = vmatpush.msrb.mxu3 %v3745_v13 }
  0xec   : > { %1547 = vmatmul.f32.vlgmr.msra.gmra.mxu0 %v3479_v28  ;;  %v1710_v28 = vsub.f32 %v1689_v32, %v1709_v33 }
  0xed   : > { %1601 = vmatpush.msra.mxu2 %v3711_v20  ;;  %1743 = vmatpush.msrb.mxu3 %v3754_v29  ;;  %v2020_v49 = vpop.permute.xlu2 %2019 }
  0xee   : > { %1578 = vmatmul.f32.vlgmr.msra.gmra.mxu1 %v3434_v16  ;;  %1765 = vmatpush.msra.mxu0 %v3703_v11  ;;  %v1711_v37 = vand.u32 4294901760, %v1710_v28  ;;  %v2021_v51 = vsel %vm182_vm0, %v2020_v49, 0 }
  0xef   : > { %3044 = vmatpush.msk.msra.mxu1 %vm3673_vm3, %v3289_v9  ;;  %v2041_v52 = vand.u32 4294901760, %v2021_v51 }
  0xf0   : > { %1768 = vmatpush.msra.mxu0 %v3711_v20  ;;  %v1712_v39 = vsub.f32 %v1710_v28, %v1711_v37 }
  0xf1   : > { %3045 = vmatpush.msk.msra.mxu1 %vm3683_vm4, %v3289_v9 }
  0xf2   : > { %1484 = vmatmul.f32.vlgmr.msrb.gmra.mxu2 %v1370_v26  ;;  %1629 = vmatmul.f32.vlgmr.msra.gmra.mxu3 %v3461_v24  ;;  %v241_v24 = vpop.f32.mrf.mxu1  ;;  %v1713_v44 = vand.u32 4294901760, %v1712_v39 }
  0xf3   : > { %3042 = vmatpush.msk.msrb.mxu2 %vm3673_vm3, %v3289_v9  ;;  %3046 = vmatpush.msk.msra.mxu3 %vm3673_vm3, %v3289_v9  ;;  %v242_v36 = vadd.f32 %v241_v24, %v210_v34 }
  0xf4   : > { %1656 = vmatmul.f32.vlgmr.msrb.gmra.mxu0 %v3434_v16 }
  0xf5   : > { %3043 = vmatpush.msk.msrb.mxu2 %vm3683_vm4, %v3289_v9  ;;  %3047 = vmatpush.msk.msra.mxu3 %vm3683_vm4, %v3289_v9 }
  0xf6   : > { %1679 = vmatmul.f32.vlgmr.msrb.gmra.mxu1 %v3434_v16  ;;  %3050 = vmatpush.msk.msrb.mxu0 %vm3673_vm3, %v3289_v9  ;;  %v267_v16 = vpop.f32.mrf.mxu2 }
  0xf7   : > { %1902 = vmatpush.msrb.mxu1 %v3745_v13  ;;  %v268_v38 = vadd.f32 %v267_v16, %v242_v36 }
  0xf8   : > { %3051 = vmatpush.msk.msrb.mxu0 %vm3683_vm4, %v3289_v9 }
  0xf9   : > { %1908 = vmatpush.msrb.mxu1 %v3754_v29 }
  0xfa   : > { %1604 = vmatmul.f32.vlgmr.msra.gmra.mxu2 %v3448_v19  ;;  %1745 = vmatmul.f32.vlgmr.msrb.gmra.mxu3 %v1709_v33  ;;  %v293_v19 = vadd.f32 %v292_v40, %v268_v38  ;;  %v342_v45 = vpop.f32.mrf.mxu1 }
  0xfb   : > { %1817 = vmatpush.msra.mxu2 %v3716_v21  ;;  %3052 = vmatpush.msk.msrb.mxu3 %vm3673_vm3, %v3289_v9 }
  0xfc   : > { %1771 = vmatmul.f32.vlgmr.msra.gmra.mxu0 %v1710_v28  ;;  %v320_v43 = vadd.f32 %v319_v42, %v293_v19  ;;  %v2685_v28 = vsel %vm182_vm0, %v2684_v6, 0 }
  0xfd   : > { %1821 = vmatpush.msra.mxu2 %v3723_v23  ;;  %3053 = vmatpush.msk.msrb.mxu3 %vm3683_vm4, %v3289_v9  ;;  %v2705_v24 = vand.u32 4294901760, %v2685_v28 }
  0xfe   : > { %1796 = vmatmul.f32.vlgmr.msra.gmra.mxu1 %v1711_v37  ;;  %1982 = vmatpush.msra.mxu0 %v3716_v21  ;;  %v343_v47 = vadd.f32 %v342_v45, %v320_v43 }
  0xff   : > { %3054 = vmatpush.msk.msra.mxu1 %vm3673_vm3, %v3289_v9  ;;  %v2706_v36 = vsub.f32 %v2685_v28, %v2705_v24 }
 0x100   : > { %1986 = vmatpush.msra.mxu0 %v3723_v23  ;;  %346 = vst.msk [vmem:[%s3840_s18] sm:$0xff] %vm345_vm5, %v343_v47 }
 0x101   : > { %3055 = vmatpush.msk.msra.mxu1 %vm3683_vm4, %v3289_v9  ;;  %v2707_v2 = vand.u32 4294901760, %v2706_v36 }
 0x102   : > { %1714 = vmatmul.f32.vlgmr.msrb.gmra.mxu2 %v1713_v44  ;;  %1846 = vmatmul.f32.vlgmr.msra.gmra.mxu3 %v1709_v33 }
 0x103   : > { %1930 = vmatpush.msrb.mxu2 %v3703_v11  ;;  %2069 = vmatpush.msra.mxu3 %v3745_v13  ;;  %v2708_v19 = vsub.f32 %v2706_v36, %v2707_v2 }
 0x104   : > { %1879 = vmatmul.f32.vlgmr.msrb.gmra.mxu0 %v3549_v41  ;;  %v2042_v41 = vsub.f32 %v2021_v51, %v2041_v52 }
 0x105   : > { %1933 = vmatpush.msrb.mxu2 %v3711_v20  ;;  %2075 = vmatpush.msra.mxu3 %v3754_v29 }
 0x106   : > { %1910 = vmatmul.f32.vlgmr.msrb.gmra.mxu1 %v3527_v30  ;;  %2097 = vmatpush.msrb.mxu0 %v3703_v11 }
 0x107   : > { %3060 = vmatpush.msk.msrb.mxu1 %vm3673_vm3, %v3289_v9 }
 0x108   : > { %2100 = vmatpush.msrb.mxu0 %v3711_v20 }
 0x109   : > { %3061 = vmatpush.msk.msrb.mxu1 %vm3683_vm4, %v3289_v9 }
 0x10a   : > { %1823 = vmatmul.f32.vlgmr.msra.gmra.mxu2 %v1709_v33  ;;  %1961 = vmatmul.f32.vlgmr.msrb.gmra.mxu3 %v3534_v35  ;;  %v2043_v35 = vand.u32 4294901760, %v2042_v41 }
 0x10b   : > { %3058 = vmatpush.msk.msra.mxu2 %vm3673_vm3, %v3289_v9  ;;  %3062 = vmatpush.msk.msrb.mxu3 %vm3673_vm3, %v3289_v9 }
 0x10c   : > { %1988 = vmatmul.f32.vlgmr.msra.gmra.mxu0 %v3527_v30 }
 0x10d   : > { %3059 = vmatpush.msk.msra.mxu2 %vm3683_vm4, %v3289_v9  ;;  %3063 = vmatpush.msk.msrb.mxu3 %vm3683_vm4, %v3289_v9 }
 0x10e   : > { %2011 = vmatmul.f32.vlgmr.msra.gmra.mxu1 %v3527_v30  ;;  %3066 = vmatpush.msk.msra.mxu0 %vm3673_vm3, %v3289_v9  ;;  %v2044_v30 = vsub.f32 %v2042_v41, %v2043_v35 }
 0x10f   : > { %2234 = vmatpush.msra.mxu1 %v3745_v13 }
 0x110   : > { %3067 = vmatpush.msk.msra.mxu0 %vm3683_vm4, %v3289_v9 }
 0x111   : > { %2240 = vmatpush.msra.mxu1 %v3754_v29 }
 0x112   : > { %1936 = vmatmul.f32.vlgmr.msrb.gmra.mxu2 %v3530_v31  ;;  %2077 = vmatmul.f32.vlgmr.msra.gmra.mxu3 %v2041_v52  ;;  %v2045_v31 = vand.u32 4294901760, %v2044_v30 }
 0x113   : > { %2149 = vmatpush.msrb.mxu2 %v3716_v21  ;;  %3068 = vmatpush.msk.msra.mxu3 %vm3673_vm3, %v3289_v9 }
 0x114   : > { %2103 = vmatmul.f32.vlgmr.msrb.gmra.mxu0 %v2042_v41 }
 0x115   : > { %2153 = vmatpush.msrb.mxu2 %v3723_v23  ;;  %3069 = vmatpush.msk.msra.mxu3 %vm3683_vm4, %v3289_v9 }
 0x116   : > { %2128 = vmatmul.f32.vlgmr.msrb.gmra.mxu1 %v2043_v35  ;;  %2314 = vmatpush.msrb.mxu0 %v3716_v21 }
 0x117   : > { %3070 = vmatpush.msk.msrb.mxu1 %vm3673_vm3, %v3289_v9 }
 0x118   : > { %2318 = vmatpush.msrb.mxu0 %v3723_v23 }
 0x119   : > { %v434_v53 = vpop.f32.mrf.mxu0  ;;  %3071 = vmatpush.msk.msrb.mxu1 %vm3683_vm4, %v3289_v9 }
 0x11a   : > { %2046 = vmatmul.f32.vlgmr.msra.gmra.mxu2 %v2045_v31  ;;  %2178 = vmatmul.f32.vlgmr.msrb.gmra.mxu3 %v2041_v52 }
 0x11b   : > { %v459_v56 = vpop.f32.mrf.mxu1  ;;  %2262 = vmatpush.msra.mxu2 %v3703_v11  ;;  %2401 = vmatpush.msrb.mxu3 %v3745_v13 }
 0x11c   : > { %2211 = vmatmul.f32.vlgmr.msra.gmra.mxu0 %v3617_v54 }
 0x11d   : > { %v408_v57 = vpop.f32.mrf.mxu3  ;;  %2265 = vmatpush.msra.mxu2 %v3711_v20  ;;  %2407 = vmatpush.msrb.mxu3 %v3754_v29 }
 0x11e   : > { %2242 = vmatmul.f32.vlgmr.msra.gmra.mxu1 %v3568_v46  ;;  %2429 = vmatpush.msra.mxu0 %v3703_v11 }
 0x11f   : > { %3076 = vmatpush.msk.msra.mxu1 %vm3673_vm3, %v3289_v9 }
 0x120   : > { %2432 = vmatpush.msra.mxu0 %v3711_v20 }
 0x121   : > { %v543_v54 = vpop.f32.mrf.mxu0  ;;  %3077 = vmatpush.msk.msra.mxu1 %vm3683_vm4, %v3289_v9 }
 0x122   : > { %2155 = vmatmul.f32.vlgmr.msrb.gmra.mxu2 %v2041_v52  ;;  %2293 = vmatmul.f32.vlgmr.msra.gmra.mxu3 %v3599_v50 }
 0x123   : > { %v574_v62 = vpop.f32.mrf.mxu1  ;;  %3074 = vmatpush.msk.msrb.mxu2 %vm3673_vm3, %v3289_v9  ;;  %3078 = vmatpush.msk.msra.mxu3 %vm3673_vm3, %v3289_v9 }
 0x124   : > { %2320 = vmatmul.f32.vlgmr.msrb.gmra.mxu0 %v3568_v46  ;;  %v575_v18 = vadd.f32 %v574_v62, %v543_v54 }
 0x125   : > { %v377_v7 = vpop.f32.mrf.mxu2  ;;  %v509_v3 = vpop.f32.mrf.mxu3  ;;  %3075 = vmatpush.msk.msrb.mxu2 %vm3683_vm4, %v3289_v9  ;;  %3079 = vmatpush.msk.msra.mxu3 %vm3683_vm4, %v3289_v9 }
 0x126   : > { %v409_v50 = vadd.f32 %v408_v57, %v377_v7  ;;  %2343 = vmatmul.f32.vlgmr.msrb.gmra.mxu1 %v3568_v46  ;;  %3082 = vmatpush.msk.msrb.mxu0 %vm3673_vm3, %v3289_v9 }
 0x127   : > { %2566 = vmatpush.msrb.mxu1 %v3745_v13 }
 0x128   : > { %v435_v1 = vadd.f32 %v434_v53, %v409_v50  ;;  %3083 = vmatpush.msk.msrb.mxu0 %vm3683_vm4, %v3289_v9 }
 0x129   : > { %v652_v12 = vpop.f32.mrf.mxu0  ;;  %2572 = vmatpush.msrb.mxu1 %v3754_v29 }
 0x12a   : > { %2268 = vmatmul.f32.vlgmr.msra.gmra.mxu2 %v3582_v48  ;;  %2409 = vmatmul.f32.vlgmr.msrb.gmra.mxu3 %v3908_v60  ;;  %v460_v22 = vadd.f32 %v459_v56, %v435_v1 }
 0x12b   : > { %v675_v46 = vpop.f32.mrf.mxu1  ;;  %2481 = vmatpush.msra.mxu2 %v3716_v21  ;;  %3084 = vmatpush.msk.msrb.mxu3 %vm3673_vm3, %v3289_v9 }
 0x12c   : > { %2435 = vmatmul.f32.vlgmr.msra.gmra.mxu0 %v2374_v63 }
 0x12d   : > { %v486_v25 = vpop.f32.mrf.mxu2  ;;  %v625_v26 = vpop.f32.mrf.mxu3  ;;  %2485 = vmatpush.msra.mxu2 %v3723_v23  ;;  %3085 = vmatpush.msk.msrb.mxu3 %vm3683_vm4, %v3289_v9 }
 0x12e   : > { %v487_v48 = vadd.f32 %v486_v25, %v460_v22  ;;  %2460 = vmatmul.f32.vlgmr.msra.gmra.mxu1 %v2375_v8  ;;  %2646 = vmatpush.msra.mxu0 %v3716_v21 }
 0x12f   : > { %3086 = vmatpush.msk.msra.mxu1 %vm3673_vm3, %v3289_v9 }
 0x130   : > { %v510_v15 = vadd.f32 %v509_v3, %v487_v48  ;;  %2650 = vmatpush.msra.mxu0 %v3723_v23 }
 0x131   : > { %v767_v5 = vpop.f32.mrf.mxu0  ;;  %3087 = vmatpush.msk.msra.mxu1 %vm3683_vm4, %v3289_v9 }
 0x132   : > { %2984 = vst.msk [vmem:[%s3840_s18 + $0x10] sm:$0xff] %vm345_vm5, %v510_v15  ;;  %2378 = vmatmul.f32.vlgmr.msrb.gmra.mxu2 %v2377_v27  ;;  %2510 = vmatmul.f32.vlgmr.msra.gmra.mxu3 %v3908_v60 }
 0x133   : > { %v792_v17 = vpop.f32.mrf.mxu1  ;;  %2594 = vmatpush.msrb.mxu2 %v3703_v11  ;;  %2733 = vmatpush.msra.mxu3 %v3745_v13 }
 0x134   : > { %2543 = vmatmul.f32.vlgmr.msrb.gmra.mxu0 %v3705_v14 }
 0x135   : > { %v600_v32 = vpop.f32.mrf.mxu2  ;;  %v741_v33 = vpop.f32.mrf.mxu3  ;;  %2597 = vmatpush.msrb.mxu2 %v3711_v20  ;;  %2739 = vmatpush.msra.mxu3 %v3754_v29 }
 0x136   : > { %v601_v34 = vadd.f32 %v600_v32, %v575_v18  ;;  %2574 = vmatmul.f32.vlgmr.msrb.gmra.mxu1 %v3637_v59  ;;  %2761 = vmatpush.msrb.mxu0 %v3703_v11 }
 0x137   : > { %3092 = vmatpush.msk.msrb.mxu1 %vm3673_vm3, %v3289_v9 }
 0x138   : > { %v626_v13 = vadd.f32 %v625_v26, %v601_v34  ;;  %2764 = vmatpush.msrb.mxu0 %v3711_v20 }
 0x139   : > { %v876_v14 = vpop.f32.mrf.mxu0  ;;  %3093 = vmatpush.msk.msrb.mxu1 %vm3683_vm4, %v3289_v9 }
 0x13a   : > { %v653_v29 = vadd.f32 %v652_v12, %v626_v13  ;;  %2487 = vmatmul.f32.vlgmr.msra.gmra.mxu2 %v3908_v60  ;;  %2625 = vmatmul.f32.vlgmr.msrb.gmra.mxu3 %v3669_v0 }
 0x13b   : > { %v907_v11 = vpop.f32.mrf.mxu1  ;;  %3090 = vmatpush.msk.msra.mxu2 %vm3673_vm3, %v3289_v9  ;;  %3094 = vmatpush.msk.msrb.mxu3 %vm3673_vm3, %v3289_v9 }
 0x13c   : > { %v676_v20 = vadd.f32 %v675_v46, %v653_v29  ;;  %2652 = vmatmul.f32.vlgmr.msra.gmra.mxu0 %v3637_v59  ;;  %v908_v47 = vadd.f32 %v907_v11, %v876_v14 }
 0x13d   : > { %v710_v37 = vpop.f32.mrf.mxu2  ;;  %v842_v16 = vpop.f32.mrf.mxu3  ;;  %3091 = vmatpush.msk.msra.mxu2 %vm3683_vm4, %v3289_v9  ;;  %3095 = vmatpush.msk.msrb.mxu3 %vm3683_vm4, %v3289_v9 }
 0x13e   : > { %2992 = vst.msk [vmem:[%s3840_s18 + $0x20] sm:$0xff] %vm345_vm5, %v676_v20  ;;  %v742_v0 = vadd.f32 %v741_v33, %v710_v37  ;;  %2675 = vmatmul.f32.vlgmr.msra.gmra.mxu1 %v3637_v59  ;;  %v2709_v59 = vand.u32 4294901760, %v2708_v19 }
 0x140   : > { %v768_v38 = vadd.f32 %v767_v5, %v742_v0 }
 0x141   : > { %v985_v39 = vpop.f32.mrf.mxu0 }
 0x142   : > { %2600 = vmatmul.f32.vlgmr.msrb.gmra.mxu2 %v3651_v61  ;;  %2741 = vmatmul.f32.vlgmr.msra.gmra.mxu3 %v2705_v24  ;;  %v793_v42 = vadd.f32 %v792_v17, %v768_v38 }
 0x143   : > { %v1008_v40 = vpop.f32.mrf.mxu1  ;;  %2813 = vmatpush.msrb.mxu2 %v3716_v21 }
 0x144   : > { %2767 = vmatmul.f32.vlgmr.msrb.gmra.mxu0 %v2706_v36 }
 0x145   : > { %v819_v4 = vpop.f32.mrf.mxu2  ;;  %v958_v9 = vpop.f32.mrf.mxu3  ;;  %2817 = vmatpush.msrb.mxu2 %v3723_v23 }
 0x146   : > { %v820_v43 = vadd.f32 %v819_v4, %v793_v42  ;;  %2792 = vmatmul.f32.vlgmr.msrb.gmra.mxu1 %v2707_v2 }
 0x148   : > { %v843_v44 = vadd.f32 %v842_v16, %v820_v43 }
 0x149   : > { %v1100_v45 = vpop.f32.mrf.mxu0 }
 0x14a   : > { %3000 = vst.msk [vmem:[%s3840_s18 + $0x30] sm:$0xff] %vm345_vm5, %v843_v44  ;;  %2710 = vmatmul.f32.vlgmr.msra.gmra.mxu2 %v2709_v59  ;;  %2842 = vmatmul.f32.vlgmr.msrb.gmra.mxu3 %v2705_v24 }
 0x14b   : > { %v1125_v61 = vpop.f32.mrf.mxu1 }
 0x14d   : > { %v933_v21 = vpop.f32.mrf.mxu2  ;;  %v1074_v49 = vpop.f32.mrf.mxu3 }
 0x14e   : > { %v934_v51 = vadd.f32 %v933_v21, %v908_v47 }
 0x150   : > { %v959_v52 = vadd.f32 %v958_v9, %v934_v51 }
 0x151   : > { %v1209_v41 = vpop.f32.mrf.mxu0 }
 0x152   : > { %v986_v35 = vadd.f32 %v985_v39, %v959_v52  ;;  %2819 = vmatmul.f32.vlgmr.msrb.gmra.mxu2 %v2705_v24 }
 0x153   : > { %v1240_v23 = vpop.f32.mrf.mxu1 }
 0x154   : > { %v1009_v30 = vadd.f32 %v1008_v40, %v986_v35  ;;  %v1241_v8 = vadd.f32 %v1240_v23, %v1209_v41 }
 0x155   : > { %v1043_v31 = vpop.f32.mrf.mxu2  ;;  %v1175_v53 = vpop.f32.mrf.mxu3 }
 0x156   : > { %3008 = vst.msk [vmem:[%s3840_s18 + $0x40] sm:$0xff] %vm345_vm5, %v1009_v30  ;;  %v1075_v55 = vadd.f32 %v1074_v49, %v1043_v31 }
 0x158   : > { %v1101_v56 = vadd.f32 %v1100_v45, %v1075_v55 }
 0x159   : > { %v1318_v57 = vpop.f32.mrf.mxu0 }
 0x15a   : > { %v1126_v60 = vadd.f32 %v1125_v61, %v1101_v56 }
 0x15b   : > { %v1341_v58 = vpop.f32.mrf.mxu1 }
 0x15d   : > { %v1152_v54 = vpop.f32.mrf.mxu2  ;;  %v1291_v62 = vpop.f32.mrf.mxu3 }
 0x15e   : > { %v1153_v63 = vadd.f32 %v1152_v54, %v1126_v60 }
 0x160   : > { %v1176_v7 = vadd.f32 %v1175_v53, %v1153_v63 }
 0x161   : > { %v1433_v3 = vpop.f32.mrf.mxu0 }
 0x162   : > { %3016 = vst.msk [vmem:[%s3840_s18 + $0x50] sm:$0xff] %vm345_vm5, %v1176_v7 }
 0x163   : > { %v1458_v50 = vpop.f32.mrf.mxu1 }
 0x165   : > { %v1266_v1 = vpop.f32.mrf.mxu2  ;;  %v1407_v12 = vpop.f32.mrf.mxu3 }
 0x166   : > { %v1267_v46 = vadd.f32 %v1266_v1, %v1241_v8 }
 0x168   : > { %v1292_v10 = vadd.f32 %v1291_v62, %v1267_v46 }
 0x169   : > { %v1548_v22 = vpop.f32.mrf.mxu0 }
 0x16a   : > { %v1319_v25 = vadd.f32 %v1318_v57, %v1292_v10 }
 0x16b   : > { %v1579_v26 = vpop.f32.mrf.mxu1 }
 0x16c   : > { %v1342_v48 = vadd.f32 %v1341_v58, %v1319_v25  ;;  %v1580_v29 = vadd.f32 %v1579_v26, %v1548_v22 }
 0x16d   : > { %v1376_v27 = vpop.f32.mrf.mxu2  ;;  %v1508_v15 = vpop.f32.mrf.mxu3 }
 0x16e   : > { %3024 = vst.msk [vmem:[%s3840_s18 + $0x60] sm:$0xff] %vm345_vm5, %v1342_v48  ;;  %v1408_v5 = vadd.f32 %v1407_v12, %v1376_v27 }
 0x170   : > { %v1434_v6 = vadd.f32 %v1433_v3, %v1408_v5 }
 0x171   : > { %v1657_v17 = vpop.f32.mrf.mxu0 }
 0x172   : > { %v1459_v32 = vadd.f32 %v1458_v50, %v1434_v6 }
 0x173   : > { %v1680_v18 = vpop.f32.mrf.mxu1 }
 0x175   : > { %v1485_v33 = vpop.f32.mrf.mxu2  ;;  %v1630_v28 = vpop.f32.mrf.mxu3 }
 0x176   : > { %v1486_v34 = vadd.f32 %v1485_v33, %v1459_v32 }
 0x178   : > { %v1509_v13 = vadd.f32 %v1508_v15, %v1486_v34 }
 0x179   : > { %v1772_v24 = vpop.f32.mrf.mxu0 }
 0x17a   : > { %3032 = vst.msk [vmem:[%s3840_s18 + $0x70] sm:$0xff] %vm345_vm5, %v1509_v13 }
 0x17b   : > { %v1797_v14 = vpop.f32.mrf.mxu1 }
 0x17d   : > { %v1605_v11 = vpop.f32.mrf.mxu2  ;;  %v1746_v20 = vpop.f32.mrf.mxu3 }
 0x17e   : > { %v1606_v36 = vadd.f32 %v1605_v11, %v1580_v29 }
 0x180   : > { %v1631_v37 = vadd.f32 %v1630_v28, %v1606_v36 }
 0x181   : > { %v1880_v16 = vpop.f32.mrf.mxu0 }
 0x182   : > { %v1658_v0 = vadd.f32 %v1657_v17, %v1631_v37 }
 0x183   : > { %v1911_v2 = vpop.f32.mrf.mxu1 }
 0x184   : > { %v1681_v38 = vadd.f32 %v1680_v18, %v1658_v0  ;;  %v1912_v21 = vadd.f32 %v1911_v2, %v1880_v16 }
 0x185   : > { %v1715_v39 = vpop.f32.mrf.mxu2  ;;  %v1847_v40 = vpop.f32.mrf.mxu3 }
 0x186   : > { %3041 = vst.msk [vmem:[%s3840_s18 + $0x8] sm:$0xff] %vm345_vm5, %v1681_v38  ;;  %v1747_v19 = vadd.f32 %v1746_v20, %v1715_v39 }
 0x188   : > { %v1773_v42 = vadd.f32 %v1772_v24, %v1747_v19 }
 0x189   : > { %v1989_v4 = vpop.f32.mrf.mxu0 }
 0x18a   : > { %v1798_v43 = vadd.f32 %v1797_v14, %v1773_v42 }
 0x18b   : > { %v2012_v9 = vpop.f32.mrf.mxu1 }
 0x18d   : > { %v1824_v59 = vpop.f32.mrf.mxu2  ;;  %v1962_v44 = vpop.f32.mrf.mxu3 }
 0x18e   : > { %v1825_v45 = vadd.f32 %v1824_v59, %v1798_v43 }
 0x190   : > { %v1848_v61 = vadd.f32 %v1847_v40, %v1825_v45 }
 0x191   : > { %v2104_v47 = vpop.f32.mrf.mxu0 }
 0x192   : > { %3048 = vst.msk [vmem:[%s3840_s18 + $0x18] sm:$0xff] %vm345_vm5, %v1848_v61 }
 0x193   : > { %v2129_v41 = vpop.f32.mrf.mxu1 }
 0x195   : > { %v1937_v49 = vpop.f32.mrf.mxu2  ;;  %v2078_v51 = vpop.f32.mrf.mxu3 }
 0x196   : > { %v1938_v52 = vadd.f32 %v1937_v49, %v1912_v21 }
 0x198   : > { %v1963_v35 = vadd.f32 %v1962_v44, %v1938_v52 }
 0x199   : > { %v2212_v31 = vpop.f32.mrf.mxu0 }
 0x19a   : > { %v1990_v23 = vadd.f32 %v1989_v4, %v1963_v35 }
 0x19b   : > { %v2243_v58 = vpop.f32.mrf.mxu1 }
 0x19c   : > { %v2013_v30 = vadd.f32 %v2012_v9, %v1990_v23  ;;  %v2244_v8 = vadd.f32 %v2243_v58, %v2212_v31 }
 0x19d   : > { %v2047_v53 = vpop.f32.mrf.mxu2  ;;  %v2179_v55 = vpop.f32.mrf.mxu3 }
 0x19e   : > { %3056 = vst.msk [vmem:[%s3840_s18 + $0x28] sm:$0xff] %vm345_vm5, %v2013_v30  ;;  %v2079_v56 = vadd.f32 %v2078_v51, %v2047_v53 }
 0x1a0   : > { %v2105_v57 = vadd.f32 %v2104_v47, %v2079_v56 }
 0x1a1   : > { %v2321_v7 = vpop.f32.mrf.mxu0 }
 0x1a2   : > { %v2130_v60 = vadd.f32 %v2129_v41, %v2105_v57 }
 0x1a3   : > { %v2344_v50 = vpop.f32.mrf.mxu1 }
 0x1a5   : > { %v2156_v54 = vpop.f32.mrf.mxu2  ;;  %v2294_v62 = vpop.f32.mrf.mxu3 }
 0x1a6   : > { %v2157_v63 = vadd.f32 %v2156_v54, %v2130_v60 }
 0x1a8   : > { %v2180_v3 = vadd.f32 %v2179_v55, %v2157_v63 }
 0x1a9   : > { %v2436_v22 = vpop.f32.mrf.mxu0 }
 0x1aa   : > { %3064 = vst.msk [vmem:[%s3840_s18 + $0x38] sm:$0xff] %vm345_vm5, %v2180_v3 }
 0x1ab   : > { %v2461_v48 = vpop.f32.mrf.mxu1 }
 0x1ad   : > { %v2269_v1 = vpop.f32.mrf.mxu2  ;;  %v2410_v46 = vpop.f32.mrf.mxu3 }
 0x1ae   : > { %v2270_v12 = vadd.f32 %v2269_v1, %v2244_v8 }
 0x1b0   : > { %v2295_v10 = vadd.f32 %v2294_v62, %v2270_v12 }
 0x1b1   : > { %v2544_v17 = vpop.f32.mrf.mxu0 }
 0x1b2   : > { %v2322_v25 = vadd.f32 %v2321_v7, %v2295_v10 }
 0x1b3   : > { %v2575_v28 = vpop.f32.mrf.mxu1 }
 0x1b4   : > { %v2345_v26 = vadd.f32 %v2344_v50, %v2322_v25  ;;  %v2576_v24 = vadd.f32 %v2575_v28, %v2544_v17 }
 0x1b5   : > { %v2379_v27 = vpop.f32.mrf.mxu2  ;;  %v2511_v6 = vpop.f32.mrf.mxu3 }
 0x1b6   : > { %3072 = vst.msk [vmem:[%s3840_s18 + $0x48] sm:$0xff] %vm345_vm5, %v2345_v26  ;;  %v2411_v15 = vadd.f32 %v2410_v46, %v2379_v27 }
 0x1b8   : > { %v2437_v5 = vadd.f32 %v2436_v22, %v2411_v15 }
 0x1b9   : > { %v2653_v14 = vpop.f32.mrf.mxu0 }
 0x1ba   : > { %v2462_v18 = vadd.f32 %v2461_v48, %v2437_v5 }
 0x1bb   : > { %v2676_v36 = vpop.f32.mrf.mxu1 }
 0x1bd   : > { %v2488_v32 = vpop.f32.mrf.mxu2  ;;  %v2626_v13 = vpop.f32.mrf.mxu3 }
 0x1be   : > { %v2489_v33 = vadd.f32 %v2488_v32, %v2462_v18 }
 0x1c0   : > { %v2512_v34 = vadd.f32 %v2511_v6, %v2489_v33 }
 0x1c1   : > { %v2768_v39 = vpop.f32.mrf.mxu0 }
 0x1c2   : > { %3080 = vst.msk [vmem:[%s3840_s18 + $0x58] sm:$0xff] %vm345_vm5, %v2512_v34 }
 0x1c3   : > { %v2793_v19 = vpop.f32.mrf.mxu1 }
 0x1c5   : > { %v2601_v29 = vpop.f32.mrf.mxu2  ;;  %v2742_v0 = vpop.f32.mrf.mxu3 }
 0x1c6   : > { %v2602_v11 = vadd.f32 %v2601_v29, %v2576_v24 }
 0x1c8   : > { %v2627_v20 = vadd.f32 %v2626_v13, %v2602_v11 }
 0x1ca   : > { %v2654_v37 = vadd.f32 %v2653_v14, %v2627_v20 }
 0x1cc   : > { %v2677_v16 = vadd.f32 %v2676_v36, %v2654_v37 }
 0x1cd   : > { %v2711_v2 = vpop.f32.mrf.mxu2  ;;  %v2843_v43 = vpop.f32.mrf.mxu3 }
 0x1ce   : > { %3088 = vst.msk [vmem:[%s3840_s18 + $0x68] sm:$0xff] %vm345_vm5, %v2677_v16  ;;  %v2743_v38 = vadd.f32 %v2742_v0, %v2711_v2 }
 0x1d0   : > { %v2769_v40 = vadd.f32 %v2768_v39, %v2743_v38 }
 0x1d2   : > { %v2794_v42 = vadd.f32 %v2793_v19, %v2769_v40 }
 0x1d5   : > { %v2820_v4 = vpop.f32.mrf.mxu2 }
 0x1d6   : > { %v2821_v9 = vadd.f32 %v2820_v4, %v2794_v42 }
 0x1d8   : > { %v2844_v59 = vadd.f32 %v2843_v43, %v2821_v9 }
 0x1da   : > { %3096 = vst.msk [vmem:[%s3840_s18 + $0x78] sm:$0xff] %vm345_vm5, %v2844_v59 }
 0x1db   : > { %3230 = shalt.err (!%p3227_p13)
}
 0x1dc   : > { %s3292_s5 = smov 128   ;;  %s3293_s13 = smov 8  }
 0x1dd   : > { %3106 = dma.vmem_to_hbm [thread:$0]  (%p3355_p9), %s2866_s26, 2048, %s2868_s27, %s2849_s9, %s3292_s5, %s3292_s5, %s3293_s13  }
 0x1de PF: > { %s2882_s15 = sand.u32 1, %s3265_s6   ;;  %p3113_p0 = pnand %p2963_p12, %p3362_p11 }
 0x1df   : > { %s2883_s16 = scalar_lea.sflag [#allocation4], %s2882_s15 }
 0x1e0   : > { %p3114_p1 = pneg %p3113_p0 }
 0x1e2   : > { %3260 = dma.done.wait (%p3114_p1), %s2883_s16, 2048  }
 0x1e3   : > { %3262 = vsyncadd (%p3114_p1), %s2883_s16, 4294965248  ;;  %s17_s11 = sadd.s32 1, %s3285_s11   ;;  %s4074_s6 = smov %s3269_s7 }
 0x1e4   : > { %p14_p2 = scmp.ge.s32.totalorder %s17_s11, 4   ;;  %s4075_s7 = smov %s3273_s8 }
 0x1e5   : > { %s4076_s8 = smov %s3360_s20  ;;  %s4077_s9 = smov %s3281_s10 }
 0x1e6   : > { %s4078_s10 = smov %s4080_s14  ;;  %16 = sbr.rel (!%p14_p2) target bundleno = 6 (0x6), region = 87 }
 0x1eb   :  { %2889 = vsyncpa [#allocation3], 1 }
 0x1ec   :  { %2891 = vsyncpa [#allocation3 + $0x1], 1 }
 0x1ed   :  { %2892 = vsyncpa [#allocation4], 1 }
 0x1ee   :  { %2894 = vsyncpa [#allocation4 + $0x1], 1 }

</bundles_post_ra>
